<compile_context>
chip_gen: v7x
topology: tpu7x:2x2x1
jax: 0.10.0
libtpu: 0.0.40
codegen_flags: <defaults>
</compile_context>

<pallas_src>
import functools

import jax
import jax.numpy as jnp
from jax.experimental import pallas as pl
from jax.experimental.pallas import tpu as pltpu


ENC_CHANNELS = [(3, 12), (12, 24), (24, 48), (48, 96)]
DEC_CHANNELS = [(96, 48), (48, 24), (24, 12), (12, 3)]
KSIZE = 4      # conv / conv-transpose kernel size
STRIDE = 2
PAD = 1
LANE = 128


def _round_up(x, m):
    return (x + m - 1) // m * m


# ----------------------------- Pallas kernel ------------------------------ #

def _gemm_bias_act_kernel(a_ref, b_ref, bias_ref, o_ref, *, act):
    # a: [TM, K] bf16, b: [K, Npad] bf16, bias: [1, Npad] f32 -> o: [TM, Npad]
    acc = jnp.dot(a_ref[...], b_ref[...], preferred_element_type=jnp.float32)
    acc = acc + bias_ref[...]
    if act == "relu":
        acc = jnp.maximum(acc, 0.0)    # VPU
    elif act == "tanh":
        acc = jnp.tanh(acc)            # EUP
    o_ref[...] = acc.astype(o_ref.dtype)


def _pick_tm(m):
    # Tile M when it is large (keeps VMEM bounded on v7x and enables the
    # "parallel" grid axis to split across TensorCores); otherwise one block.
    for tm in (1024, 512, 256):
        if m > tm and m % tm == 0:
            return tm
    return m


def gemm_bias_act(a, b, bias, act, out_dtype):
    """Fused (a @ b + bias) -> activation on the MXU.

    a: [M, K] bf16 im2col patches, b: [K, Npad] bf16 padded weights,
    bias: [1, Npad] f32.  Npad is a multiple of 128 so stores are lane-dense.
    """
    M, K = a.shape
    K2, Npad = b.shape
    assert K == K2 and Npad % LANE == 0, (K, K2, Npad)
    tm = _pick_tm(M)

    def nbytes(x):
        return x.size * x.dtype.itemsize

    cost = pl.CostEstimate(
        flops=2 * M * K * Npad,
        transcendentals=(M * Npad if act == "tanh" else 0),
        bytes_accessed=nbytes(a) + nbytes(b) + nbytes(bias)
        + M * Npad * jnp.dtype(out_dtype).itemsize,
    )
    return pl.pallas_call(
        functools.partial(_gemm_bias_act_kernel, act=act),
        out_shape=jax.ShapeDtypeStruct((M, Npad), out_dtype),
        grid=(M // tm,),
        in_specs=[
            pl.BlockSpec((tm, K), lambda i: (i, 0)),
            pl.BlockSpec((K, Npad), lambda i: (0, 0)),
            pl.BlockSpec((1, Npad), lambda i: (0, 0)),
        ],
        out_specs=pl.BlockSpec((tm, Npad), lambda i: (i, 0)),
        compiler_params=pltpu.CompilerParams(
            dimension_semantics=("parallel",),
            vmem_limit_bytes=32 * 1024 * 1024,
        ),
        cost_estimate=cost,
    )(a, b, bias)


# ------------------------------ Conv helpers ------------------------------ #

def _im2col_nhwc(x, kh, kw, stride, padding):
    """x: [N, H, W, C] -> [N*Ho*Wo, kh*kw*C]; feature order (ki, kj, c)."""
    n, h, w, c = x.shape
    xp = jnp.pad(x, ((0, 0), (padding, padding), (padding, padding), (0, 0)))
    ho = (h + 2 * padding - kh) // stride + 1
    wo = (w + 2 * padding - kw) // stride + 1
    patches = []
    for ki in range(kh):
        for kj in range(kw):
            patches.append(
                xp[:, ki:ki + stride * ho:stride, kj:kj + stride * wo:stride, :])
    col = jnp.stack(patches, axis=3)                 # [N, Ho, Wo, kh*kw, C]
    col = col.reshape(n * ho * wo, kh * kw * c)
    return col, ho, wo


def conv2d_layer(x, w_mat, bias, cout, act, out_dtype):
    """PyTorch Conv2d(3->..., k=4, s=2, p=1) in NHWC via im2col + fused GEMM."""
    n = x.shape[0]
    col, ho, wo = _im2col_nhwc(x, KSIZE, KSIZE, STRIDE, PAD)
    out = gemm_bias_act(col, w_mat, bias, act, out_dtype)     # [M, Npad]
    return out[:, :cout].reshape(n, ho, wo, cout)


def conv_transpose2d_layer(x, w_mat, bias, cout, act, out_dtype):
    """PyTorch ConvTranspose2d(k=4, s=2, p=1) in NHWC via the sub-pixel
    decomposition: one 3x3 / stride-1 im2col + one GEMM producing all four
    output phases in its columns, then a pixel shuffle."""
    n, h, w, _ = x.shape
    col, _, _ = _im2col_nhwc(x, 3, 3, stride=1, padding=1)    # [N*H*W, 9*Cin]
    out = gemm_bias_act(col, w_mat, bias, act, out_dtype)     # [M, Npad]
    out = out[:, :4 * cout].reshape(n, h, w, 2, 2, cout)      # (ry, rx) phases
    out = out.transpose(0, 1, 3, 2, 4, 5).reshape(n, 2 * h, 2 * w, cout)
    return out


# ------------------------------ Model params ------------------------------ #

def init_params(key):
    """PyTorch-layout params (Conv2d: [Cout,Cin,kh,kw]; ConvT: [Cin,Cout,kh,kw])."""
    params = {"enc": [], "dec": []}
    for cin, cout in ENC_CHANNELS:
        key, kw_, kb_ = jax.random.split(key, 3)
        bound = 1.0 / jnp.sqrt(cin * KSIZE * KSIZE)
        w = jax.random.uniform(kw_, (cout, cin, KSIZE, KSIZE), jnp.float32, -bound, bound)
        b = jax.random.uniform(kb_, (cout,), jnp.float32, -bound, bound)
        params["enc"].append((w, b))
    for cin, cout in DEC_CHANNELS:
        key, kw_, kb_ = jax.random.split(key, 3)
        bound = 1.0 / jnp.sqrt(cout * KSIZE * KSIZE)
        w = jax.random.uniform(kw_, (cin, cout, KSIZE, KSIZE), jnp.float32, -bound, bound)
        b = jax.random.uniform(kb_, (cout,), jnp.float32, -bound, bound)
        params["dec"].append((w, b))
    return params


def _pad_cols(mat, bias, npad):
    k, nreal = mat.shape
    mat = jnp.pad(mat, ((0, 0), (0, npad - nreal))).astype(jnp.bfloat16)
    bias = jnp.pad(bias, (0, npad - nreal)).astype(jnp.float32).reshape(1, npad)
    return mat, bias


def prepare_params(params):
    """One-time weight prep: GEMM-ready, bf16, lane-padded (multiple-of-128)."""
    prepped = {"enc": [], "dec": []}
    for (w, b) in params["enc"]:
        cout, cin, kh, kw = w.shape
        # Feature order (ky, kx, ci) matches NHWC im2col.
        w_mat = w.transpose(2, 3, 1, 0).reshape(kh * kw * cin, cout)
        prepped["enc"].append(_pad_cols(w_mat, b, _round_up(cout, LANE)))
    for (w, b) in params["dec"]:
        cin, cout, kh, kw = w.shape                  # kh = kw = 4
        # Phase-combined 3x3 kernel.  Output pixel (2*qy+ry, 2*qx+rx) reads
        # input (qy-1+a, qx-1+b) with original tap (ky, kx) = (ry+3-2a, rx+3-2b)
        # when that tap is in range; all other entries are structural zeros.
        w3 = jnp.zeros((3, 3, cin, 2, 2, cout), dtype=jnp.float32)
        for a in range(3):
            for ry in range(2):
                ky = ry + 3 - 2 * a
                if not 0 <= ky < kh:
                    continue
                for bb in range(3):
                    for rx in range(2):
                        kx = rx + 3 - 2 * bb
                        if not 0 <= kx < kw:
                            continue
                        w3 = w3.at[a, bb, :, ry, rx, :].set(w[:, :, ky, kx])
        w_mat = w3.reshape(9 * cin, 4 * cout)        # rows (a,b,ci), cols (ry,rx,co)
        bias4 = jnp.tile(b, 4)                       # same bias for every phase
        prepped["dec"].append(_pad_cols(w_mat, bias4, _round_up(4 * cout, LANE)))
    return prepped


# -------------------------------- Forward ---------------------------------- #

def conv_autoencoder_forward(prepped, x):
    """x: [N, 3, H, W] f32 (NCHW, PyTorch layout) -> [N, 3, H, W] f32."""
    x = x.transpose(0, 2, 3, 1).astype(jnp.bfloat16)          # NHWC, bf16 activations
    # Encoder: 4 x [Conv2d(k=4, s=2, p=1) + ReLU]
    for (w_mat, bias), (_, cout) in zip(prepped["enc"], ENC_CHANNELS):
        x = conv2d_layer(x, w_mat, bias, cout, act="relu", out_dtype=jnp.bfloat16)
    # Decoder: 3 x [ConvTranspose2d + ReLU] + [ConvTranspose2d + Tanh]
    n_dec = len(DEC_CHANNELS)
    for i, ((w_mat, bias), (_, cout)) in enumerate(zip(prepped["dec"], DEC_CHANNELS)):
        last = i == n_dec - 1
        x = conv_transpose2d_layer(
            x, w_mat, bias, cout,
            act="tanh" if last else "relu",
            out_dtype=jnp.float32 if last else jnp.bfloat16)
    return x.transpose(0, 3, 1, 2)                             # back to NCHW


# ---------------------------------- Main ----------------------------------- #

if __name__ == "__main__":
    key = jax.random.PRNGKey(0)
    k_x, k_p = jax.random.split(key)

    # NCHW, 3 input channels, spatial size divisible by 2^4.
    x = jax.random.normal(k_x, (2, 3, 32, 32), dtype=jnp.float32)
    params = init_params(k_p)
    prepped = prepare_params(params)

    fwd = jax.jit(conv_autoencoder_forward)
    y = jax.block_until_ready(fwd(prepped, x))

    assert y.shape == x.shape, (y.shape, x.shape)
    assert y.dtype == jnp.float32
    # Tanh output must lie in [-1, 1].
    assert bool(jnp.all(jnp.abs(y) <= 1.0 + 1e-6))

    print("KERNEL_OK")
</pallas_src>

<mosaic_0001>
module attributes {stable_mosaic.version = 11 : i64} {
  func.func @_gemm_bias_act_kernel(%arg0: i32, %arg1: memref<256x48xbf16, #tpu.memory_space<vmem>>, %arg2: memref<48x128xbf16, #tpu.memory_space<vmem>>, %arg3: memref<1x128xf32, #tpu.memory_space<vmem>>, %arg4: memref<256x128xbf16, #tpu.memory_space<vmem>>) attributes {dimension_semantics = [#tpu.dimension_semantics<parallel>], iteration_bounds = array<i64: 2>, scalar_prefetch = 0 : i64, scratch_operands = 0 : i64, tpu.core_type = #tpu.core_type<tc>, window_params = [{transform_indices = @transform_0, window_bounds = array<i64: 256, 48>}, {pipeline_mode = #tpu.pipeline_mode<synchronous>, transform_indices = @transform_1, window_bounds = array<i64: 48, 128>}, {pipeline_mode = #tpu.pipeline_mode<synchronous>, transform_indices = @transform_2, window_bounds = array<i64: 1, 128>}, {transform_indices = @transform_3, window_bounds = array<i64: 256, 128>}]} {
    %c0 = arith.constant 0 : index
    %c0_0 = arith.constant 0 : index
    %0 = vector.load %arg1[%c0, %c0_0] : memref<256x48xbf16, #tpu.memory_space<vmem>>, vector<256x48xbf16>
    %c0_1 = arith.constant 0 : index
    %c0_2 = arith.constant 0 : index
    %1 = vector.load %arg2[%c0_1, %c0_2] : memref<48x128xbf16, #tpu.memory_space<vmem>>, vector<48x128xbf16>
    %cst = arith.constant dense<0.000000e+00> : vector<256x128xf32>
    %2 = tpu.matmul %0, %1, %cst {dimension_numbers = #tpu.dot_dimension_numbers<[1], [0], [0], [1], [0, 0, 1, 1], [], []>} : vector<256x48xbf16>, vector<48x128xbf16>, vector<256x128xf32> -> vector<256x128xf32>
    %c0_3 = arith.constant 0 : index
    %c0_4 = arith.constant 0 : index
    %3 = vector.load %arg3[%c0_3, %c0_4] : memref<1x128xf32, #tpu.memory_space<vmem>>, vector<1x128xf32>
    %4 = vector.broadcast %3 : vector<1x128xf32> to vector<256x128xf32>
    %5 = arith.addf %2, %4 : vector<256x128xf32>
    %cst_5 = arith.constant 0.000000e+00 : f32
    %6 = vector.broadcast %cst_5 : f32 to vector<256x128xf32>
    %7 = arith.maximumf %5, %6 : vector<256x128xf32>
    %8 = arith.truncf %7 : vector<256x128xf32> to vector<256x128xbf16>
    %c0_6 = arith.constant 0 : index
    %c0_7 = arith.constant 0 : index
    %9 = vector.load %arg4[%c0_6, %c0_7] : memref<256x128xbf16, #tpu.memory_space<vmem>>, vector<256x128xbf16>
    tpu.vector_store %arg4[%c0_6, %c0_7], %8 {strides = array<i32>} : memref<256x128xbf16, #tpu.memory_space<vmem>>, vector<256x128xbf16>,
    return
  }
  func.func @transform_0(%arg0: i32) -> (i32, i32) {
    %c0_i32 = arith.constant 0 : i32
    %c0_i32_0 = arith.constant 0 : i32
    return %arg0, %c0_i32 : i32, i32
  }
  func.func @transform_1(%arg0: i32) -> (i32, i32) {
    %c0_i32 = arith.constant 0 : i32
    %c0_i32_0 = arith.constant 0 : i32
    %c0_i32_1 = arith.constant 0 : i32
    return %c0_i32, %c0_i32_0 : i32, i32
  }
  func.func @transform_2(%arg0: i32) -> (i32, i32) {
    %c0_i32 = arith.constant 0 : i32
    %c0_i32_0 = arith.constant 0 : i32
    %c0_i32_1 = arith.constant 0 : i32
    return %c0_i32, %c0_i32_0 : i32, i32
  }
  func.func @transform_3(%arg0: i32) -> (i32, i32) {
    %c0_i32 = arith.constant 0 : i32
    %c0_i32_0 = arith.constant 0 : i32
    return %arg0, %c0_i32 : i32, i32
  }
}

module attributes {stable_mosaic.version = 11 : i64} {
  func.func @_gemm_bias_act_kernel(%arg0: i32, %arg1: memref<128x192xbf16, #tpu.memory_space<vmem>>, %arg2: memref<192x128xbf16, #tpu.memory_space<vmem>>, %arg3: memref<1x128xf32, #tpu.memory_space<vmem>>, %arg4: memref<128x128xbf16, #tpu.memory_space<vmem>>) attributes {dimension_semantics = [#tpu.dimension_semantics<parallel>], iteration_bounds = array<i64: 1>, scalar_prefetch = 0 : i64, scratch_operands = 0 : i64, tpu.core_type = #tpu.core_type<tc>, window_params = [{transform_indices = @transform_0, window_bounds = array<i64: 128, 192>}, {pipeline_mode = #tpu.pipeline_mode<synchronous>, transform_indices = @transform_1, window_bounds = array<i64: 192, 128>}, {pipeline_mode = #tpu.pipeline_mode<synchronous>, transform_indices = @transform_2, window_bounds = array<i64: 1, 128>}, {transform_indices = @transform_3, window_bounds = array<i64: 128, 128>}]} {
    %c0 = arith.constant 0 : index
    %c0_0 = arith.constant 0 : index
    %0 = vector.load %arg1[%c0, %c0_0] : memref<128x192xbf16, #tpu.memory_space<vmem>>, vector<128x192xbf16>
    %c0_1 = arith.constant 0 : index
    %c0_2 = arith.constant 0 : index
    %1 = vector.load %arg2[%c0_1, %c0_2] : memref<192x128xbf16, #tpu.memory_space<vmem>>, vector<192x128xbf16>
    %cst = arith.constant dense<0.000000e+00> : vector<128x128xf32>
    %2 = tpu.matmul %0, %1, %cst {dimension_numbers = #tpu.dot_dimension_numbers<[1], [0], [0], [1], [0, 0, 1, 1], [], []>} : vector<128x192xbf16>, vector<192x128xbf16>, vector<128x128xf32> -> vector<128x128xf32>
    %c0_3 = arith.constant 0 : index
    %c0_4 = arith.constant 0 : index
    %3 = vector.load %arg3[%c0_3, %c0_4] : memref<1x128xf32, #tpu.memory_space<vmem>>, vector<1x128xf32>
    %4 = vector.broadcast %3 : vector<1x128xf32> to vector<128x128xf32>
    %5 = arith.addf %2, %4 : vector<128x128xf32>
    %cst_5 = arith.constant 0.000000e+00 : f32
    %6 = vector.broadcast %cst_5 : f32 to vector<128x128xf32>
    %7 = arith.maximumf %5, %6 : vector<128x128xf32>
    %8 = arith.truncf %7 : vector<128x128xf32> to vector<128x128xbf16>
    %c0_6 = arith.constant 0 : index
    %c0_7 = arith.constant 0 : index
    %9 = vector.load %arg4[%c0_6, %c0_7] : memref<128x128xbf16, #tpu.memory_space<vmem>>, vector<128x128xbf16>
    tpu.vector_store %arg4[%c0_6, %c0_7], %8 {strides = array<i32>} : memref<128x128xbf16, #tpu.memory_space<vmem>>, vector<128x128xbf16>,
    return
  }
  func.func @transform_0(%arg0: i32) -> (i32, i32) {
    %c0_i32 = arith.constant 0 : i32
    %c0_i32_0 = arith.constant 0 : i32
    return %arg0, %c0_i32 : i32, i32
  }
  func.func @transform_1(%arg0: i32) -> (i32, i32) {
    %c0_i32 = arith.constant 0 : i32
    %c0_i32_0 = arith.constant 0 : i32
    %c0_i32_1 = arith.constant 0 : i32
    return %c0_i32, %c0_i32_0 : i32, i32
  }
  func.func @transform_2(%arg0: i32) -> (i32, i32) {
    %c0_i32 = arith.constant 0 : i32
    %c0_i32_0 = arith.constant 0 : i32
    %c0_i32_1 = arith.constant 0 : i32
    return %c0_i32, %c0_i32_0 : i32, i32
  }
  func.func @transform_3(%arg0: i32) -> (i32, i32) {
    %c0_i32 = arith.constant 0 : i32
    %c0_i32_0 = arith.constant 0 : i32
    return %arg0, %c0_i32 : i32, i32
  }
}

module attributes {stable_mosaic.version = 11 : i64} {
  func.func @_gemm_bias_act_kernel(%arg0: i32, %arg1: memref<32x384xbf16, #tpu.memory_space<vmem>>, %arg2: memref<384x128xbf16, #tpu.memory_space<vmem>>, %arg3: memref<1x128xf32, #tpu.memory_space<vmem>>, %arg4: memref<32x128xbf16, #tpu.memory_space<vmem>>) attributes {dimension_semantics = [#tpu.dimension_semantics<parallel>], iteration_bounds = array<i64: 1>, scalar_prefetch = 0 : i64, scratch_operands = 0 : i64, tpu.core_type = #tpu.core_type<tc>, window_params = [{transform_indices = @transform_0, window_bounds = array<i64: 32, 384>}, {pipeline_mode = #tpu.pipeline_mode<synchronous>, transform_indices = @transform_1, window_bounds = array<i64: 384, 128>}, {pipeline_mode = #tpu.pipeline_mode<synchronous>, transform_indices = @transform_2, window_bounds = array<i64: 1, 128>}, {transform_indices = @transform_3, window_bounds = array<i64: 32, 128>}]} {
    %c0 = arith.constant 0 : index
    %c0_0 = arith.constant 0 : index
    %0 = vector.load %arg1[%c0, %c0_0] : memref<32x384xbf16, #tpu.memory_space<vmem>>, vector<32x384xbf16>
    %c0_1 = arith.constant 0 : index
    %c0_2 = arith.constant 0 : index
    %1 = vector.load %arg2[%c0_1, %c0_2] : memref<384x128xbf16, #tpu.memory_space<vmem>>, vector<384x128xbf16>
    %cst = arith.constant dense<0.000000e+00> : vector<32x128xf32>
    %2 = tpu.matmul %0, %1, %cst {dimension_numbers = #tpu.dot_dimension_numbers<[1], [0], [0], [1], [0, 0, 1, 1], [], []>} : vector<32x384xbf16>, vector<384x128xbf16>, vector<32x128xf32> -> vector<32x128xf32>
    %c0_3 = arith.constant 0 : index
    %c0_4 = arith.constant 0 : index
    %3 = vector.load %arg3[%c0_3, %c0_4] : memref<1x128xf32, #tpu.memory_space<vmem>>, vector<1x128xf32>
    %4 = vector.broadcast %3 : vector<1x128xf32> to vector<32x128xf32>
    %5 = arith.addf %2, %4 : vector<32x128xf32>
    %cst_5 = arith.constant 0.000000e+00 : f32
    %6 = vector.broadcast %cst_5 : f32 to vector<32x128xf32>
    %7 = arith.maximumf %5, %6 : vector<32x128xf32>
    %8 = arith.truncf %7 : vector<32x128xf32> to vector<32x128xbf16>
    %c0_6 = arith.constant 0 : index
    %c0_7 = arith.constant 0 : index
    %9 = vector.load %arg4[%c0_6, %c0_7] : memref<32x128xbf16, #tpu.memory_space<vmem>>, vector<32x128xbf16>
    tpu.vector_store %arg4[%c0_6, %c0_7], %8 {strides = array<i32>} : memref<32x128xbf16, #tpu.memory_space<vmem>>, vector<32x128xbf16>,
    return
  }
  func.func @transform_0(%arg0: i32) -> (i32, i32) {
    %c0_i32 = arith.constant 0 : i32
    %c0_i32_0 = arith.constant 0 : i32
    return %arg0, %c0_i32 : i32, i32
  }
  func.func @transform_1(%arg0: i32) -> (i32, i32) {
    %c0_i32 = arith.constant 0 : i32
    %c0_i32_0 = arith.constant 0 : i32
    %c0_i32_1 = arith.constant 0 : i32
    return %c0_i32, %c0_i32_0 : i32, i32
  }
  func.func @transform_2(%arg0: i32) -> (i32, i32) {
    %c0_i32 = arith.constant 0 : i32
    %c0_i32_0 = arith.constant 0 : i32
    %c0_i32_1 = arith.constant 0 : i32
    return %c0_i32, %c0_i32_0 : i32, i32
  }
  func.func @transform_3(%arg0: i32) -> (i32, i32) {
    %c0_i32 = arith.constant 0 : i32
    %c0_i32_0 = arith.constant 0 : i32
    return %arg0, %c0_i32 : i32, i32
  }
}

module attributes {stable_mosaic.version = 11 : i64} {
  func.func @_gemm_bias_act_kernel(%arg0: i32, %arg1: memref<8x768xbf16, #tpu.memory_space<vmem>>, %arg2: memref<768x128xbf16, #tpu.memory_space<vmem>>, %arg3: memref<1x128xf32, #tpu.memory_space<vmem>>, %arg4: memref<8x128xbf16, #tpu.memory_space<vmem>>) attributes {dimension_semantics = [#tpu.dimension_semantics<parallel>], iteration_bounds = array<i64: 1>, scalar_prefetch = 0 : i64, scratch_operands = 0 : i64, tpu.core_type = #tpu.core_type<tc>, window_params = [{transform_indices = @transform_0, window_bounds = array<i64: 8, 768>}, {pipeline_mode = #tpu.pipeline_mode<synchronous>, transform_indices = @transform_1, window_bounds = array<i64: 768, 128>}, {pipeline_mode = #tpu.pipeline_mode<synchronous>, transform_indices = @transform_2, window_bounds = array<i64: 1, 128>}, {transform_indices = @transform_3, window_bounds = array<i64: 8, 128>}]} {
    %c0 = arith.constant 0 : index
    %c0_0 = arith.constant 0 : index
    %0 = vector.load %arg1[%c0, %c0_0] : memref<8x768xbf16, #tpu.memory_space<vmem>>, vector<8x768xbf16>
    %c0_1 = arith.constant 0 : index
    %c0_2 = arith.constant 0 : index
    %1 = vector.load %arg2[%c0_1, %c0_2] : memref<768x128xbf16, #tpu.memory_space<vmem>>, vector<768x128xbf16>
    %cst = arith.constant dense<0.000000e+00> : vector<8x128xf32>
    %2 = tpu.matmul %0, %1, %cst {dimension_numbers = #tpu.dot_dimension_numbers<[1], [0], [0], [1], [0, 0, 1, 1], [], []>} : vector<8x768xbf16>, vector<768x128xbf16>, vector<8x128xf32> -> vector<8x128xf32>
    %c0_3 = arith.constant 0 : index
    %c0_4 = arith.constant 0 : index
    %3 = vector.load %arg3[%c0_3, %c0_4] : memref<1x128xf32, #tpu.memory_space<vmem>>, vector<1x128xf32>
    %4 = vector.broadcast %3 : vector<1x128xf32> to vector<8x128xf32>
    %5 = arith.addf %2, %4 : vector<8x128xf32>
    %cst_5 = arith.constant 0.000000e+00 : f32
    %6 = vector.broadcast %cst_5 : f32 to vector<8x128xf32>
    %7 = arith.maximumf %5, %6 : vector<8x128xf32>
    %8 = arith.truncf %7 : vector<8x128xf32> to vector<8x128xbf16>
    %c0_6 = arith.constant 0 : index
    %c0_7 = arith.constant 0 : index
    %9 = vector.load %arg4[%c0_6, %c0_7] : memref<8x128xbf16, #tpu.memory_space<vmem>>, vector<8x128xbf16>
    tpu.vector_store %arg4[%c0_6, %c0_7], %8 {strides = array<i32>} : memref<8x128xbf16, #tpu.memory_space<vmem>>, vector<8x128xbf16>,
    return
  }
  func.func @transform_0(%arg0: i32) -> (i32, i32) {
    %c0_i32 = arith.constant 0 : i32
    %c0_i32_0 = arith.constant 0 : i32
    return %arg0, %c0_i32 : i32, i32
  }
  func.func @transform_1(%arg0: i32) -> (i32, i32) {
    %c0_i32 = arith.constant 0 : i32
    %c0_i32_0 = arith.constant 0 : i32
    %c0_i32_1 = arith.constant 0 : i32
    return %c0_i32, %c0_i32_0 : i32, i32
  }
  func.func @transform_2(%arg0: i32) -> (i32, i32) {
    %c0_i32 = arith.constant 0 : i32
    %c0_i32_0 = arith.constant 0 : i32
    %c0_i32_1 = arith.constant 0 : i32
    return %c0_i32, %c0_i32_0 : i32, i32
  }
  func.func @transform_3(%arg0: i32) -> (i32, i32) {
    %c0_i32 = arith.constant 0 : i32
    %c0_i32_0 = arith.constant 0 : i32
    return %arg0, %c0_i32 : i32, i32
  }
}

module attributes {stable_mosaic.version = 11 : i64} {
  func.func @_gemm_bias_act_kernel(%arg0: i32, %arg1: memref<8x864xbf16, #tpu.memory_space<vmem>>, %arg2: memref<864x256xbf16, #tpu.memory_space<vmem>>, %arg3: memref<1x256xf32, #tpu.memory_space<vmem>>, %arg4: memref<8x256xbf16, #tpu.memory_space<vmem>>) attributes {dimension_semantics = [#tpu.dimension_semantics<parallel>], iteration_bounds = array<i64: 1>, scalar_prefetch = 0 : i64, scratch_operands = 0 : i64, tpu.core_type = #tpu.core_type<tc>, window_params = [{transform_indices = @transform_0, window_bounds = array<i64: 8, 864>}, {pipeline_mode = #tpu.pipeline_mode<synchronous>, transform_indices = @transform_1, window_bounds = array<i64: 864, 256>}, {pipeline_mode = #tpu.pipeline_mode<synchronous>, transform_indices = @transform_2, window_bounds = array<i64: 1, 256>}, {transform_indices = @transform_3, window_bounds = array<i64: 8, 256>}]} {
    %c0 = arith.constant 0 : index
    %c0_0 = arith.constant 0 : index
    %0 = vector.load %arg1[%c0, %c0_0] : memref<8x864xbf16, #tpu.memory_space<vmem>>, vector<8x864xbf16>
    %c0_1 = arith.constant 0 : index
    %c0_2 = arith.constant 0 : index
    %1 = vector.load %arg2[%c0_1, %c0_2] : memref<864x256xbf16, #tpu.memory_space<vmem>>, vector<864x256xbf16>
    %cst = arith.constant dense<0.000000e+00> : vector<8x256xf32>
    %2 = tpu.matmul %0, %1, %cst {dimension_numbers = #tpu.dot_dimension_numbers<[1], [0], [0], [1], [0, 0, 1, 1], [], []>} : vector<8x864xbf16>, vector<864x256xbf16>, vector<8x256xf32> -> vector<8x256xf32>
    %c0_3 = arith.constant 0 : index
    %c0_4 = arith.constant 0 : index
    %3 = vector.load %arg3[%c0_3, %c0_4] : memref<1x256xf32, #tpu.memory_space<vmem>>, vector<1x256xf32>
    %4 = vector.broadcast %3 : vector<1x256xf32> to vector<8x256xf32>
    %5 = arith.addf %2, %4 : vector<8x256xf32>
    %cst_5 = arith.constant 0.000000e+00 : f32
    %6 = vector.broadcast %cst_5 : f32 to vector<8x256xf32>
    %7 = arith.maximumf %5, %6 : vector<8x256xf32>
    %8 = arith.truncf %7 : vector<8x256xf32> to vector<8x256xbf16>
    %c0_6 = arith.constant 0 : index
    %c0_7 = arith.constant 0 : index
    %9 = vector.load %arg4[%c0_6, %c0_7] : memref<8x256xbf16, #tpu.memory_space<vmem>>, vector<8x256xbf16>
    tpu.vector_store %arg4[%c0_6, %c0_7], %8 {strides = array<i32>} : memref<8x256xbf16, #tpu.memory_space<vmem>>, vector<8x256xbf16>,
    return
  }
  func.func @transform_0(%arg0: i32) -> (i32, i32) {
    %c0_i32 = arith.constant 0 : i32
    %c0_i32_0 = arith.constant 0 : i32
    return %arg0, %c0_i32 : i32, i32
  }
  func.func @transform_1(%arg0: i32) -> (i32, i32) {
    %c0_i32 = arith.constant 0 : i32
    %c0_i32_0 = arith.constant 0 : i32
    %c0_i32_1 = arith.constant 0 : i32
    return %c0_i32, %c0_i32_0 : i32, i32
  }
  func.func @transform_2(%arg0: i32) -> (i32, i32) {
    %c0_i32 = arith.constant 0 : i32
    %c0_i32_0 = arith.constant 0 : i32
    %c0_i32_1 = arith.constant 0 : i32
    return %c0_i32, %c0_i32_0 : i32, i32
  }
  func.func @transform_3(%arg0: i32) -> (i32, i32) {
    %c0_i32 = arith.constant 0 : i32
    %c0_i32_0 = arith.constant 0 : i32
    return %arg0, %c0_i32 : i32, i32
  }
}

module attributes {stable_mosaic.version = 11 : i64} {
  func.func @_gemm_bias_act_kernel(%arg0: i32, %arg1: memref<32x432xbf16, #tpu.memory_space<vmem>>, %arg2: memref<432x128xbf16, #tpu.memory_space<vmem>>, %arg3: memref<1x128xf32, #tpu.memory_space<vmem>>, %arg4: memref<32x128xbf16, #tpu.memory_space<vmem>>) attributes {dimension_semantics = [#tpu.dimension_semantics<parallel>], iteration_bounds = array<i64: 1>, scalar_prefetch = 0 : i64, scratch_operands = 0 : i64, tpu.core_type = #tpu.core_type<tc>, window_params = [{transform_indices = @transform_0, window_bounds = array<i64: 32, 432>}, {pipeline_mode = #tpu.pipeline_mode<synchronous>, transform_indices = @transform_1, window_bounds = array<i64: 432, 128>}, {pipeline_mode = #tpu.pipeline_mode<synchronous>, transform_indices = @transform_2, window_bounds = array<i64: 1, 128>}, {transform_indices = @transform_3, window_bounds = array<i64: 32, 128>}]} {
    %c0 = arith.constant 0 : index
    %c0_0 = arith.constant 0 : index
    %0 = vector.load %arg1[%c0, %c0_0] : memref<32x432xbf16, #tpu.memory_space<vmem>>, vector<32x432xbf16>
    %c0_1 = arith.constant 0 : index
    %c0_2 = arith.constant 0 : index
    %1 = vector.load %arg2[%c0_1, %c0_2] : memref<432x128xbf16, #tpu.memory_space<vmem>>, vector<432x128xbf16>
    %cst = arith.constant dense<0.000000e+00> : vector<32x128xf32>
    %2 = tpu.matmul %0, %1, %cst {dimension_numbers = #tpu.dot_dimension_numbers<[1], [0], [0], [1], [0, 0, 1, 1], [], []>} : vector<32x432xbf16>, vector<432x128xbf16>, vector<32x128xf32> -> vector<32x128xf32>
    %c0_3 = arith.constant 0 : index
    %c0_4 = arith.constant 0 : index
    %3 = vector.load %arg3[%c0_3, %c0_4] : memref<1x128xf32, #tpu.memory_space<vmem>>, vector<1x128xf32>
    %4 = vector.broadcast %3 : vector<1x128xf32> to vector<32x128xf32>
    %5 = arith.addf %2, %4 : vector<32x128xf32>
    %cst_5 = arith.constant 0.000000e+00 : f32
    %6 = vector.broadcast %cst_5 : f32 to vector<32x128xf32>
    %7 = arith.maximumf %5, %6 : vector<32x128xf32>
    %8 = arith.truncf %7 : vector<32x128xf32> to vector<32x128xbf16>
    %c0_6 = arith.constant 0 : index
    %c0_7 = arith.constant 0 : index
    %9 = vector.load %arg4[%c0_6, %c0_7] : memref<32x128xbf16, #tpu.memory_space<vmem>>, vector<32x128xbf16>
    tpu.vector_store %arg4[%c0_6, %c0_7], %8 {strides = array<i32>} : memref<32x128xbf16, #tpu.memory_space<vmem>>, vector<32x128xbf16>,
    return
  }
  func.func @transform_0(%arg0: i32) -> (i32, i32) {
    %c0_i32 = arith.constant 0 : i32
    %c0_i32_0 = arith.constant 0 : i32
    return %arg0, %c0_i32 : i32, i32
  }
  func.func @transform_1(%arg0: i32) -> (i32, i32) {
    %c0_i32 = arith.constant 0 : i32
    %c0_i32_0 = arith.constant 0 : i32
    %c0_i32_1 = arith.constant 0 : i32
    return %c0_i32, %c0_i32_0 : i32, i32
  }
  func.func @transform_2(%arg0: i32) -> (i32, i32) {
    %c0_i32 = arith.constant 0 : i32
    %c0_i32_0 = arith.constant 0 : i32
    %c0_i32_1 = arith.constant 0 : i32
    return %c0_i32, %c0_i32_0 : i32, i32
  }
  func.func @transform_3(%arg0: i32) -> (i32, i32) {
    %c0_i32 = arith.constant 0 : i32
    %c0_i32_0 = arith.constant 0 : i32
    return %arg0, %c0_i32 : i32, i32
  }
}

module attributes {stable_mosaic.version = 11 : i64} {
  func.func @_gemm_bias_act_kernel(%arg0: i32, %arg1: memref<128x216xbf16, #tpu.memory_space<vmem>>, %arg2: memref<216x128xbf16, #tpu.memory_space<vmem>>, %arg3: memref<1x128xf32, #tpu.memory_space<vmem>>, %arg4: memref<128x128xbf16, #tpu.memory_space<vmem>>) attributes {dimension_semantics = [#tpu.dimension_semantics<parallel>], iteration_bounds = array<i64: 1>, scalar_prefetch = 0 : i64, scratch_operands = 0 : i64, tpu.core_type = #tpu.core_type<tc>, window_params = [{transform_indices = @transform_0, window_bounds = array<i64: 128, 216>}, {pipeline_mode = #tpu.pipeline_mode<synchronous>, transform_indices = @transform_1, window_bounds = array<i64: 216, 128>}, {pipeline_mode = #tpu.pipeline_mode<synchronous>, transform_indices = @transform_2, window_bounds = array<i64: 1, 128>}, {transform_indices = @transform_3, window_bounds = array<i64: 128, 128>}]} {
    %c0 = arith.constant 0 : index
    %c0_0 = arith.constant 0 : index
    %0 = vector.load %arg1[%c0, %c0_0] : memref<128x216xbf16, #tpu.memory_space<vmem>>, vector<128x216xbf16>
    %c0_1 = arith.constant 0 : index
    %c0_2 = arith.constant 0 : index
    %1 = vector.load %arg2[%c0_1, %c0_2] : memref<216x128xbf16, #tpu.memory_space<vmem>>, vector<216x128xbf16>
    %cst = arith.constant dense<0.000000e+00> : vector<128x128xf32>
    %2 = tpu.matmul %0, %1, %cst {dimension_numbers = #tpu.dot_dimension_numbers<[1], [0], [0], [1], [0, 0, 1, 1], [], []>} : vector<128x216xbf16>, vector<216x128xbf16>, vector<128x128xf32> -> vector<128x128xf32>
    %c0_3 = arith.constant 0 : index
    %c0_4 = arith.constant 0 : index
    %3 = vector.load %arg3[%c0_3, %c0_4] : memref<1x128xf32, #tpu.memory_space<vmem>>, vector<1x128xf32>
    %4 = vector.broadcast %3 : vector<1x128xf32> to vector<128x128xf32>
    %5 = arith.addf %2, %4 : vector<128x128xf32>
    %cst_5 = arith.constant 0.000000e+00 : f32
    %6 = vector.broadcast %cst_5 : f32 to vector<128x128xf32>
    %7 = arith.maximumf %5, %6 : vector<128x128xf32>
    %8 = arith.truncf %7 : vector<128x128xf32> to vector<128x128xbf16>
    %c0_6 = arith.constant 0 : index
    %c0_7 = arith.constant 0 : index
    %9 = vector.load %arg4[%c0_6, %c0_7] : memref<128x128xbf16, #tpu.memory_space<vmem>>, vector<128x128xbf16>
    tpu.vector_store %arg4[%c0_6, %c0_7], %8 {strides = array<i32>} : memref<128x128xbf16, #tpu.memory_space<vmem>>, vector<128x128xbf16>,
    return
  }
  func.func @transform_0(%arg0: i32) -> (i32, i32) {
    %c0_i32 = arith.constant 0 : i32
    %c0_i32_0 = arith.constant 0 : i32
    return %arg0, %c0_i32 : i32, i32
  }
  func.func @transform_1(%arg0: i32) -> (i32, i32) {
    %c0_i32 = arith.constant 0 : i32
    %c0_i32_0 = arith.constant 0 : i32
    %c0_i32_1 = arith.constant 0 : i32
    return %c0_i32, %c0_i32_0 : i32, i32
  }
  func.func @transform_2(%arg0: i32) -> (i32, i32) {
    %c0_i32 = arith.constant 0 : i32
    %c0_i32_0 = arith.constant 0 : i32
    %c0_i32_1 = arith.constant 0 : i32
    return %c0_i32, %c0_i32_0 : i32, i32
  }
  func.func @transform_3(%arg0: i32) -> (i32, i32) {
    %c0_i32 = arith.constant 0 : i32
    %c0_i32_0 = arith.constant 0 : i32
    return %arg0, %c0_i32 : i32, i32
  }
}

module attributes {stable_mosaic.version = 11 : i64} {
  func.func @_gemm_bias_act_kernel(%arg0: i32, %arg1: memref<256x108xbf16, #tpu.memory_space<vmem>>, %arg2: memref<108x128xbf16, #tpu.memory_space<vmem>>, %arg3: memref<1x128xf32, #tpu.memory_space<vmem>>, %arg4: memref<256x128xf32, #tpu.memory_space<vmem>>) attributes {dimension_semantics = [#tpu.dimension_semantics<parallel>], iteration_bounds = array<i64: 2>, scalar_prefetch = 0 : i64, scratch_operands = 0 : i64, tpu.core_type = #tpu.core_type<tc>, window_params = [{transform_indices = @transform_0, window_bounds = array<i64: 256, 108>}, {pipeline_mode = #tpu.pipeline_mode<synchronous>, transform_indices = @transform_1, window_bounds = array<i64: 108, 128>}, {pipeline_mode = #tpu.pipeline_mode<synchronous>, transform_indices = @transform_2, window_bounds = array<i64: 1, 128>}, {transform_indices = @transform_3, window_bounds = array<i64: 256, 128>}]} {
    %c0 = arith.constant 0 : index
    %c0_0 = arith.constant 0 : index
    %0 = vector.load %arg1[%c0, %c0_0] : memref<256x108xbf16, #tpu.memory_space<vmem>>, vector<256x108xbf16>
    %c0_1 = arith.constant 0 : index
    %c0_2 = arith.constant 0 : index
    %1 = vector.load %arg2[%c0_1, %c0_2] : memref<108x128xbf16, #tpu.memory_space<vmem>>, vector<108x128xbf16>
    %cst = arith.constant dense<0.000000e+00> : vector<256x128xf32>
    %2 = tpu.matmul %0, %1, %cst {dimension_numbers = #tpu.dot_dimension_numbers<[1], [0], [0], [1], [0, 0, 1, 1], [], []>} : vector<256x108xbf16>, vector<108x128xbf16>, vector<256x128xf32> -> vector<256x128xf32>
    %c0_3 = arith.constant 0 : index
    %c0_4 = arith.constant 0 : index
    %3 = vector.load %arg3[%c0_3, %c0_4] : memref<1x128xf32, #tpu.memory_space<vmem>>, vector<1x128xf32>
    %4 = vector.broadcast %3 : vector<1x128xf32> to vector<256x128xf32>
    %5 = arith.addf %2, %4 : vector<256x128xf32>
    %6 = math.tanh %5 : vector<256x128xf32>
    %c0_5 = arith.constant 0 : index
    %c0_6 = arith.constant 0 : index
    %7 = vector.load %arg4[%c0_5, %c0_6] : memref<256x128xf32, #tpu.memory_space<vmem>>, vector<256x128xf32>
    tpu.vector_store %arg4[%c0_5, %c0_6], %6 {strides = array<i32>} : memref<256x128xf32, #tpu.memory_space<vmem>>, vector<256x128xf32>,
    return
  }
  func.func @transform_0(%arg0: i32) -> (i32, i32) {
    %c0_i32 = arith.constant 0 : i32
    %c0_i32_0 = arith.constant 0 : i32
    return %arg0, %c0_i32 : i32, i32
  }
  func.func @transform_1(%arg0: i32) -> (i32, i32) {
    %c0_i32 = arith.constant 0 : i32
    %c0_i32_0 = arith.constant 0 : i32
    %c0_i32_1 = arith.constant 0 : i32
    return %c0_i32, %c0_i32_0 : i32, i32
  }
  func.func @transform_2(%arg0: i32) -> (i32, i32) {
    %c0_i32 = arith.constant 0 : i32
    %c0_i32_0 = arith.constant 0 : i32
    %c0_i32_1 = arith.constant 0 : i32
    return %c0_i32, %c0_i32_0 : i32, i32
  }
  func.func @transform_3(%arg0: i32) -> (i32, i32) {
    %c0_i32 = arith.constant 0 : i32
    %c0_i32_0 = arith.constant 0 : i32
    return %arg0, %c0_i32 : i32, i32
  }
}

</mosaic_0001>

<bundles_post_ra>
// kernel: conv_autoencoder_forward.8
= control target key start
LH: loop header
LB: loop body
LE: loop exit
PB: predicated region body
PF: predicated region fallthrough
CT: control target
= control target key end

     0   :  { %s1100_s12 = smov 0   ;;  %s1222_s0 = inlined_call_operand.vmem [shape: bf16[512,48], index: 0, kind: input, shape index: {}]   ;;  %s1223_s1 = inlined_call_operand.vmem [shape: bf16[48,128], index: 1, kind: input, shape index: {}]   ;;  %s1224_s2 = inlined_call_operand.vmem [shape: f32[1,128], index: 2, kind: input, shape index: {}]   ;;  %s1225_s3 = inlined_call_operand.vmem [shape: bf16[512,128], index: 3, kind: output, shape index: {}]  }
   0x1 LB: > { %s776_s13 = sadd.s32 4294967295, %s1078_s12   ;;  %p780_p0 = scmp.ge.s32.totalorder %s1078_s12, 1  ;;  %s1078_s12 = sphi %s1100_s12, %s13_s12  }
   0x2   : > { %p138_p1 = scmp.lt.s32.totalorder %s1078_s12, 3 }
   0x4   : > { %p139_p2 = pnand %p780_p0, %p138_p1 }
   0x5   : > { %v1053_v0 = vld [vmem:[%s1223_s1] sm:$0xff] (!%p139_p2)   ;;  %s781_s16 = sshll.u32 (!%p139_p2), %s776_s13, 5  ;;  %v1054_v1 = vld [vmem:[%s1223_s1 + $0x8] sm:$0xff] (!%p139_p2)   ;;  %v1055_v2 = vld [vmem:[%s1223_s1 + $0x10] sm:$0xff] (!%p139_p2)   ;;  %vm318_vm0 = vcmask (!%p139_p2), 392192  }
   0x6   : > { %142 = sbr.rel (%p139_p2) target bundleno = 265 (0x109), region = 32  ;;  %p163_p3 = scmp.lt.s32.totalorder (!%p139_p2), %s781_s16, 63  ;;  %1001 = vmatprep.subr.bf16.mxu0 (!%p139_p2), %v1053_v0  ;;  %1039 = vmatprep.subr.bf16.mxu1 (!%p139_p2), %v1053_v0  ;;  %v1162_v19 = vld [vmem:[%s1224_s2] ss:$0 sm:$0xff] (!%p139_p2) }
   0x7   : > { %1002 = vmatpush3.bf16.msra.mxu0 (!%p139_p2), %v1053_v0  ;;  %1042 = vmatpush3.bf16.msra.mxu1 (!%p139_p2), %v1053_v0 }
   0x8   : > { %1003 = vmatprep.subr.bf16.mxu0 (!%p139_p2), %v1054_v1  ;;  %1040 = vmatprep.subr.bf16.mxu1 (!%p139_p2), %v1054_v1 }
   0xb   : > { %1004 = vmatpush3.bf16.msra.mxu0 (!%p139_p2), %v1054_v1  ;;  %1043 = vmatpush3.bf16.msra.mxu1 (!%p139_p2), %v1054_v1 }
   0xc   : > { %1005 = vmatprep.subr.bf16.mxu0 (!%p139_p2), %v1055_v2  ;;  %1041 = vmatprep.subr.bf16.mxu1 (!%p139_p2), %v1055_v2 }
   0xd   : > { %s1227_s16 = smov (!%p163_p3, %s781_s16), 63 }
   0xe   : > { %s782_s21 = sshll.u32 %s1227_s16, 2 }
   0xf   : > { %s1125_s24 = scalar_lea.vmem %s1222_s0, %s782_s21  ;;  %1006 = vmatpush3.bf16.msra.mxu0 %v1055_v2  ;;  %1044 = vmatpush3.bf16.msra.mxu1 %v1055_v2  ;;  %s1177_s29 = scalar_lea.vmem %s1225_s3, %s782_s21 }
  0x10   : > { %v1056_v3 = vld [vmem:[%s1125_s24] sm:$0xff]   ;;  %v1058_v5 = vld [vmem:[%s1125_s24 + $0x8] sm:$0xff]   ;;  %v1060_v7 = vld [vmem:[%s1125_s24 + $0x10] sm:$0xff]  }
  0x11   : > { %v1057_v4 = vld [vmem:[%s1125_s24 + $0x40] sm:$0xff]   ;;  %1007 = vmatprep.mubr.msk.bf16.mxu0 %vm318_vm0, %v1056_v3  ;;  %v1059_v6 = vld [vmem:[%s1125_s24 + $0x48] sm:$0xff]   ;;  %v1061_v8 = vld [vmem:[%s1125_s24 + $0x50] sm:$0xff]  }
  0x12   : > { %1023 = vmatprep.mubr.msk.bf16.mxu1 %vm318_vm0, %v1057_v4  ;;  %1008 = vmatmul.mubr.msk.bf16.vlgmr.msra.gmra.mrb[0].mxu0 %vm318_vm0, %v1058_v5  ;;  %v1062_v9 = vld [vmem:[%s1125_s24 + $0x18] sm:$0xff]   ;;  %v1064_v11 = vld [vmem:[%s1125_s24 + $0x20] sm:$0xff]   ;;  %v1066_v13 = vld [vmem:[%s1125_s24 + $0x28] sm:$0xff]  }
  0x13   : > { %1024 = vmatmul.mubr.msk.bf16.vlgmr.msra.gmra.mrb[0].mxu1 %vm318_vm0, %v1059_v6  ;;  %1011 = vmatprep.mubr.msk.bf16.mxu0 %vm318_vm0, %v1060_v7  ;;  %v1063_v10 = vld [vmem:[%s1125_s24 + $0x58] sm:$0xff]   ;;  %v1065_v12 = vld [vmem:[%s1125_s24 + $0x60] sm:$0xff]   ;;  %v1067_v14 = vld [vmem:[%s1125_s24 + $0x68] sm:$0xff]  }
  0x14   : > { %1027 = vmatprep.mubr.msk.bf16.mxu1 %vm318_vm0, %v1061_v8  ;;  %v1068_v15 = vld [vmem:[%s1125_s24 + $0x30] sm:$0xff]   ;;  %v1070_v17 = vld [vmem:[%s1125_s24 + $0x38] sm:$0xff]  }
  0x15   : > { %v1069_v16 = vld [vmem:[%s1125_s24 + $0x70] sm:$0xff]   ;;  %v1071_v18 = vld [vmem:[%s1125_s24 + $0x78] sm:$0xff]  }
  0x1a   : > { %1012 = vmatmul.mubr.msk.bf16.gmra.mrb[4].mxu0 %vm318_vm0, %v1062_v9 }
  0x1b   : > { %1028 = vmatmul.mubr.msk.bf16.gmra.mrb[4].mxu1 %vm318_vm0, %v1063_v10  ;;  %1015 = vmatprep.mubr.msk.bf16.mxu0 %vm318_vm0, %v1064_v11 }
  0x1c   : > { %1031 = vmatprep.mubr.msk.bf16.mxu1 %vm318_vm0, %v1065_v12 }
  0x22   : > { %1016 = vmatmul.mubr.msk.bf16.gmra.mrb[8].mxu0 %vm318_vm0, %v1066_v13 }
  0x23   : > { %1032 = vmatmul.mubr.msk.bf16.gmra.mrb[8].mxu1 %vm318_vm0, %v1067_v14  ;;  %1019 = vmatprep.mubr.msk.bf16.mxu0 %vm318_vm0, %v1068_v15 }
  0x24   : > { %1035 = vmatprep.mubr.msk.bf16.mxu1 %vm318_vm0, %v1069_v16 }
  0x2a   : > { %1020 = vmatmul.mubr.msk.bf16.gmra.mrb[12].mxu0 %vm318_vm0, %v1070_v17 }
  0x2b   : > { %1036 = vmatmul.mubr.msk.bf16.gmra.mrb[12].mxu1 %vm318_vm0, %v1071_v18 }
  0xe5   : > { %v1009_v20 = vpop.f32.mrb[0].mxu0 }
  0xe6   : > { %v1025_v21 = vpop.f32.mrb[0].mxu1  ;;  %v410_v22 = vadd.f32 %v1009_v20, %v1162_v19  ;;  %v401_v24 = vpop.f32.mrb[1].mxu0 }
  0xe7   : > { %v474_v23 = vadd.f32 %v1025_v21, %v1162_v19  ;;  %v465_v25 = vpop.f32.mrb[1].mxu1  ;;  %v402_v26 = vadd.f32 %v1162_v19, %v401_v24  ;;  %v1010_v28 = vpop.f32.mrb[2].mxu0 }
  0xe8   : > { %v466_v27 = vadd.f32 %v1162_v19, %v465_v25  ;;  %v1026_v29 = vpop.f32.mrb[2].mxu1  ;;  %v413_v30 = vadd.f32 %v1010_v28, %v1162_v19  ;;  %v404_v32 = vpop.f32.mrb[3].mxu0  ;;  %v530_v36 = vmax.f32 %v410_v22, 0.0 }
  0xe9   : > { %v477_v31 = vadd.f32 %v1026_v29, %v1162_v19  ;;  %v468_v33 = vpop.f32.mrb[3].mxu1  ;;  %v405_v34 = vadd.f32 %v1162_v19, %v404_v32  ;;  %v546_v37 = vmax.f32 %v474_v23, 0.0  ;;  %v528_v40 = vmax.f32 %v402_v26, 0.0 }
  0xea   : > { %v469_v35 = vadd.f32 %v1162_v19, %v468_v33  ;;  %v531_v38 = vmax.f32 %v413_v30, 0.0  ;;  %v544_v41 = vmax.f32 %v466_v27, 0.0 }
  0xeb   : > { %v547_v39 = vmax.f32 %v477_v31, 0.0  ;;  %v529_v42 = vmax.f32 %v405_v34, 0.0 }
  0xec   : > { %v545_v43 = vmax.f32 %v469_v35, 0.0  ;;  %v895_v44 = vpack.c.bf16 %v531_v38, %v530_v36 }
  0xed   : > { %v935_v45 = vpack.c.bf16 %v547_v39, %v546_v37  ;;  %v890_v46 = vpack.c.bf16 %v529_v42, %v528_v40  ;;  %v1013_v48 = vpop.f32.mrb[4].mxu0 }
  0xee   : > { %v930_v47 = vpack.c.bf16 %v545_v43, %v544_v41  ;;  %v1029_v49 = vpop.f32.mrb[4].mxu1  ;;  %967 = vst [vmem:[%s1177_s29 + $0x8] sm:$0xff] %v895_v44   ;;  %v426_v50 = vadd.f32 %v1013_v48, %v1162_v19  ;;  %v417_v52 = vpop.f32.mrb[5].mxu0 }
  0xef   : > { %975 = vst [vmem:[%s1177_s29 + $0x48] sm:$0xff] %v935_v45   ;;  %v490_v51 = vadd.f32 %v1029_v49, %v1162_v19  ;;  %v481_v53 = vpop.f32.mrb[5].mxu1  ;;  %891 = vst [vmem:[%s1177_s29] sm:$0xff] %v890_v46   ;;  %v418_v54 = vadd.f32 %v1162_v19, %v417_v52  ;;  %v1014_v56 = vpop.f32.mrb[6].mxu0 }
  0xf0   : > { %974 = vst [vmem:[%s1177_s29 + $0x40] sm:$0xff] %v930_v47   ;;  %v482_v55 = vadd.f32 %v1162_v19, %v481_v53  ;;  %v1030_v57 = vpop.f32.mrb[6].mxu1  ;;  %v429_v58 = vadd.f32 %v1014_v56, %v1162_v19  ;;  %v420_v60 = vpop.f32.mrb[7].mxu0  ;;  %v534_v0 = vmax.f32 %v426_v50, 0.0 }
  0xf1   : > { %v493_v59 = vadd.f32 %v1030_v57, %v1162_v19  ;;  %v484_v61 = vpop.f32.mrb[7].mxu1  ;;  %v421_v62 = vadd.f32 %v1162_v19, %v420_v60  ;;  %v550_v1 = vmax.f32 %v490_v51, 0.0  ;;  %v532_v4 = vmax.f32 %v418_v54, 0.0 }
  0xf2   : > { %v485_v63 = vadd.f32 %v1162_v19, %v484_v61  ;;  %v535_v2 = vmax.f32 %v429_v58, 0.0  ;;  %v548_v5 = vmax.f32 %v482_v55, 0.0 }
  0xf3   : > { %v551_v3 = vmax.f32 %v493_v59, 0.0  ;;  %v533_v6 = vmax.f32 %v421_v62, 0.0 }
  0xf4   : > { %v549_v7 = vmax.f32 %v485_v63, 0.0  ;;  %v905_v8 = vpack.c.bf16 %v535_v2, %v534_v0 }
  0xf5   : > { %v945_v9 = vpack.c.bf16 %v551_v3, %v550_v1  ;;  %v900_v10 = vpack.c.bf16 %v533_v6, %v532_v4  ;;  %v1017_v12 = vpop.f32.mrb[8].mxu0 }
  0xf6   : > { %v940_v11 = vpack.c.bf16 %v549_v7, %v548_v5  ;;  %v1033_v13 = vpop.f32.mrb[8].mxu1  ;;  %969 = vst [vmem:[%s1177_s29 + $0x18] sm:$0xff] %v905_v8   ;;  %v442_v14 = vadd.f32 %v1017_v12, %v1162_v19  ;;  %v433_v16 = vpop.f32.mrb[9].mxu0 }
  0xf7   : > { %977 = vst [vmem:[%s1177_s29 + $0x58] sm:$0xff] %v945_v9   ;;  %v506_v15 = vadd.f32 %v1033_v13, %v1162_v19  ;;  %v497_v17 = vpop.f32.mrb[9].mxu1  ;;  %968 = vst [vmem:[%s1177_s29 + $0x10] sm:$0xff] %v900_v10   ;;  %v434_v18 = vadd.f32 %v1162_v19, %v433_v16  ;;  %v1018_v21 = vpop.f32.mrb[10].mxu0 }
  0xf8   : > { %976 = vst [vmem:[%s1177_s29 + $0x50] sm:$0xff] %v940_v11   ;;  %v498_v20 = vadd.f32 %v1162_v19, %v497_v17  ;;  %v1034_v22 = vpop.f32.mrb[10].mxu1  ;;  %v445_v23 = vadd.f32 %v1018_v21, %v1162_v19  ;;  %v436_v25 = vpop.f32.mrb[11].mxu0  ;;  %v538_v29 = vmax.f32 %v442_v14, 0.0 }
  0xf9   : > { %v509_v24 = vadd.f32 %v1034_v22, %v1162_v19  ;;  %v500_v26 = vpop.f32.mrb[11].mxu1  ;;  %v437_v27 = vadd.f32 %v1162_v19, %v436_v25  ;;  %v554_v30 = vmax.f32 %v506_v15, 0.0  ;;  %v536_v33 = vmax.f32 %v434_v18, 0.0 }
  0xfa   : > { %v501_v28 = vadd.f32 %v1162_v19, %v500_v26  ;;  %v539_v31 = vmax.f32 %v445_v23, 0.0  ;;  %v552_v34 = vmax.f32 %v498_v20, 0.0 }
  0xfb   : > { %v555_v32 = vmax.f32 %v509_v24, 0.0  ;;  %v537_v35 = vmax.f32 %v437_v27, 0.0 }
  0xfc   : > { %v553_v36 = vmax.f32 %v501_v28, 0.0  ;;  %v915_v37 = vpack.c.bf16 %v539_v31, %v538_v29 }
  0xfd   : > { %v955_v38 = vpack.c.bf16 %v555_v32, %v554_v30  ;;  %v910_v39 = vpack.c.bf16 %v537_v35, %v536_v33  ;;  %v1021_v41 = vpop.f32.mrb[12].mxu0 }
  0xfe   : > { %v950_v40 = vpack.c.bf16 %v553_v36, %v552_v34  ;;  %v1037_v42 = vpop.f32.mrb[12].mxu1  ;;  %971 = vst [vmem:[%s1177_s29 + $0x28] sm:$0xff] %v915_v37   ;;  %v458_v43 = vadd.f32 %v1021_v41, %v1162_v19  ;;  %v449_v45 = vpop.f32.mrb[13].mxu0 }
  0xff   : > { %979 = vst [vmem:[%s1177_s29 + $0x68] sm:$0xff] %v955_v38   ;;  %v522_v44 = vadd.f32 %v1037_v42, %v1162_v19  ;;  %v513_v46 = vpop.f32.mrb[13].mxu1  ;;  %970 = vst [vmem:[%s1177_s29 + $0x20] sm:$0xff] %v910_v39   ;;  %v450_v47 = vadd.f32 %v1162_v19, %v449_v45  ;;  %v1022_v49 = vpop.f32.mrb[14].mxu0 }
 0x100   : > { %978 = vst [vmem:[%s1177_s29 + $0x60] sm:$0xff] %v950_v40   ;;  %v514_v48 = vadd.f32 %v1162_v19, %v513_v46  ;;  %v1038_v50 = vpop.f32.mrb[14].mxu1  ;;  %v461_v51 = vadd.f32 %v1022_v49, %v1162_v19  ;;  %v452_v53 = vpop.f32.mrb[15].mxu0  ;;  %v542_v57 = vmax.f32 %v458_v43, 0.0 }
 0x101   : > { %v525_v52 = vadd.f32 %v1038_v50, %v1162_v19  ;;  %v516_v54 = vpop.f32.mrb[15].mxu1  ;;  %v453_v55 = vadd.f32 %v1162_v19, %v452_v53  ;;  %v558_v58 = vmax.f32 %v522_v44, 0.0  ;;  %v540_v61 = vmax.f32 %v450_v47, 0.0 }
 0x102   : > { %v517_v56 = vadd.f32 %v1162_v19, %v516_v54  ;;  %v543_v59 = vmax.f32 %v461_v51, 0.0  ;;  %v556_v62 = vmax.f32 %v514_v48, 0.0 }
 0x103   : > { %v559_v60 = vmax.f32 %v525_v52, 0.0  ;;  %v541_v63 = vmax.f32 %v453_v55, 0.0 }
 0x104   : > { %v557_v0 = vmax.f32 %v517_v56, 0.0  ;;  %v925_v1 = vpack.c.bf16 %v543_v59, %v542_v57 }
 0x105   : > { %v965_v2 = vpack.c.bf16 %v559_v60, %v558_v58  ;;  %v920_v3 = vpack.c.bf16 %v541_v63, %v540_v61 }
 0x106   : > { %v960_v4 = vpack.c.bf16 %v557_v0, %v556_v62  ;;  %973 = vst [vmem:[%s1177_s29 + $0x38] sm:$0xff] %v925_v1  }
 0x107   : > { %981 = vst [vmem:[%s1177_s29 + $0x78] sm:$0xff] %v965_v2   ;;  %972 = vst [vmem:[%s1177_s29 + $0x30] sm:$0xff] %v920_v3  }
 0x108   : > { %980 = vst [vmem:[%s1177_s29 + $0x70] sm:$0xff] %v960_v4  }
 0x109 PF: > { %s13_s12 = sadd.s32 1, %s1078_s12  }
 0x10a   : > { %p10_p4 = scmp.ge.s32.totalorder %s13_s12, 4  }
 0x10c   :  { %12 = sbr.rel (!%p10_p4) target bundleno = 1 (0x1), region = 62 }

// kernel: conv_autoencoder_forward.9
= control target key start
LH: loop header
LB: loop body
LE: loop exit
PB: predicated region body
PF: predicated region fallthrough
CT: control target
= control target key end

     0   :  { %v605_v0 = vmov 0   ;;  %vm206_vm0 = vcmask 523264   ;;  %s787_s1 = inlined_call_operand.vmem [shape: bf16[192,128], index: 1, kind: input, shape index: {}]   ;;  %s788_s0 = inlined_call_operand.vmem [shape: bf16[128,192], index: 0, kind: input, shape index: {}]   ;;  %s789_s2 = inlined_call_operand.vmem [shape: f32[1,128], index: 2, kind: input, shape index: {}]   ;;  %s790_s3 = inlined_call_operand.vmem [shape: bf16[128,128], index: 3, kind: output, shape index: {}]  }
   0x1   :  { %231 = vmatprep.subr.bf16.mxu0 %v605_v0  ;;  %544 = vmatprep.subr.bf16.mxu1 %v605_v0  ;;  %v569_v1 = vld [vmem:[%s787_s1] sm:$0xff]   ;;  %v570_v2 = vld [vmem:[%s787_s1 + $0x8] sm:$0xff]   ;;  %v571_v3 = vld [vmem:[%s787_s1 + $0x10] sm:$0xff]  }
   0x2   :  { %232 = vmatpush1.bf16.msra.mxu0 %v569_v1  ;;  %556 = vmatpush1.bf16.msra.mxu1 %v569_v1  ;;  %v572_v4 = vld [vmem:[%s787_s1 + $0x18] sm:$0xff]   ;;  %v583_v5 = vld [vmem:[%s788_s0 + $0x4] ss:$8 sps:$4 sm:$0xff]   ;;  %v575_v9 = vld [vmem:[%s787_s1 + $0x30] sm:$0xff]  }
   0x3   :  { %233 = vmatprep.subr.bf16.mxu0 %v605_v0  ;;  %545 = vmatprep.subr.bf16.mxu1 %v605_v0  ;;  %v573_v6 = vld [vmem:[%s787_s1 + $0x20] sm:$0xff]   ;;  %v574_v8 = vld [vmem:[%s787_s1 + $0x28] sm:$0xff]   ;;  %v576_v10 = vld [vmem:[%s787_s1 + $0x38] sm:$0xff]  }
   0x4   :  { %v586_v7 = vld [vmem:[%s788_s0 + $0x44] ss:$8 sps:$4 sm:$0xff]   ;;  %457 = vmatprep.mubr.msk.bf16.mxu0 %vm206_vm0, %v583_v5  ;;  %v579_v13 = vld [vmem:[%s787_s1 + $0x50] sm:$0xff]   ;;  %v580_v14 = vld [vmem:[%s787_s1 + $0x58] sm:$0xff]  }
   0x5   :  { %461 = vmatprep.mubr.msk.bf16.mxu1 %vm206_vm0, %v586_v7  ;;  %v577_v11 = vld [vmem:[%s787_s1 + $0x40] sm:$0xff]   ;;  %v578_v12 = vld [vmem:[%s787_s1 + $0x48] sm:$0xff]   ;;  %v587_v17 = vld [vmem:[%s788_s0 + $0x14] ss:$8 sps:$4 sm:$0xff]  }
   0x6   :  { %234 = vmatpush1.bf16.msra.mxu0 %v570_v2  ;;  %557 = vmatpush1.bf16.msra.mxu1 %v570_v2  ;;  %v581_v15 = vld [vmem:[%s788_s0] ss:$8 sps:$4 sm:$0xff]   ;;  %v589_v18 = vld [vmem:[%s788_s0 + $0x54] ss:$8 sps:$4 sm:$0xff]   ;;  %v591_v19 = vld [vmem:[%s788_s0 + $0x10] ss:$8 sps:$4 sm:$0xff]  }
   0x7   :  { %235 = vmatprep.subr.bf16.mxu0 %v605_v0  ;;  %546 = vmatprep.subr.bf16.mxu1 %v605_v0  ;;  %v584_v16 = vld [vmem:[%s788_s0 + $0x40] ss:$8 sps:$4 sm:$0xff]   ;;  %v592_v20 = vld [vmem:[%s788_s0 + $0x50] ss:$8 sps:$4 sm:$0xff]   ;;  %v593_v21 = vld [vmem:[%s788_s0 + $0x24] ss:$8 sps:$4 sm:$0xff]  }
   0x8   :  { %v595_v22 = vld [vmem:[%s788_s0 + $0x64] ss:$8 sps:$4 sm:$0xff]   ;;  %v597_v23 = vld [vmem:[%s788_s0 + $0x20] ss:$8 sps:$4 sm:$0xff]   ;;  %v599_v25 = vld [vmem:[%s788_s0 + $0x34] ss:$8 sps:$4 sm:$0xff]  }
   0x9   :  { %v598_v24 = vld [vmem:[%s788_s0 + $0x60] ss:$8 sps:$4 sm:$0xff]   ;;  %v601_v26 = vld [vmem:[%s788_s0 + $0x74] ss:$8 sps:$4 sm:$0xff]   ;;  %v603_v27 = vld [vmem:[%s788_s0 + $0x30] ss:$8 sps:$4 sm:$0xff]  }
   0xa   :  { %236 = vmatpush1.bf16.msra.mxu0 %v571_v3  ;;  %558 = vmatpush1.bf16.msra.mxu1 %v571_v3  ;;  %v604_v28 = vld [vmem:[%s788_s0 + $0x70] ss:$8 sps:$4 sm:$0xff]   ;;  %v745_v29 = vld [vmem:[%s789_s2] ss:$0 sm:$0xff] }
   0xb   :  { %237 = vmatprep.subr.bf16.mxu0 %v605_v0  ;;  %547 = vmatprep.subr.bf16.mxu1 %v605_v0 }
   0xe   :  { %238 = vmatpush1.bf16.msra.mxu0 %v572_v4  ;;  %559 = vmatpush1.bf16.msra.mxu1 %v572_v4 }
   0xf   :  { %239 = vmatprep.subr.bf16.mxu0 %v605_v0  ;;  %548 = vmatprep.subr.bf16.mxu1 %v605_v0 }
  0x12   :  { %240 = vmatpush1.bf16.msra.mxu0 %v573_v6  ;;  %560 = vmatpush1.bf16.msra.mxu1 %v573_v6 }
  0x13   :  { %241 = vmatprep.subr.bf16.mxu0 %v605_v0  ;;  %549 = vmatprep.subr.bf16.mxu1 %v605_v0 }
  0x16   :  { %242 = vmatpush1.bf16.msra.mxu0 %v574_v8  ;;  %561 = vmatpush1.bf16.msra.mxu1 %v574_v8 }
  0x17   :  { %243 = vmatprep.subr.bf16.mxu0 %v605_v0  ;;  %550 = vmatprep.subr.bf16.mxu1 %v605_v0 }
  0x1a   :  { %244 = vmatpush1.bf16.msra.mxu0 %v575_v9  ;;  %562 = vmatpush1.bf16.msra.mxu1 %v575_v9 }
  0x1b   :  { %245 = vmatprep.subr.bf16.mxu0 %v605_v0  ;;  %551 = vmatprep.subr.bf16.mxu1 %v605_v0 }
  0x1e   :  { %246 = vmatpush1.bf16.msra.mxu0 %v576_v10  ;;  %563 = vmatpush1.bf16.msra.mxu1 %v576_v10 }
  0x1f   :  { %247 = vmatprep.subr.bf16.mxu0 %v605_v0  ;;  %552 = vmatprep.subr.bf16.mxu1 %v605_v0 }
  0x22   :  { %248 = vmatpush1.bf16.msra.mxu0 %v577_v11  ;;  %564 = vmatpush1.bf16.msra.mxu1 %v577_v11 }
  0x23   :  { %249 = vmatprep.subr.bf16.mxu0 %v605_v0  ;;  %553 = vmatprep.subr.bf16.mxu1 %v605_v0 }
  0x26   :  { %250 = vmatpush1.bf16.msra.mxu0 %v578_v12  ;;  %565 = vmatpush1.bf16.msra.mxu1 %v578_v12 }
  0x27   :  { %251 = vmatprep.subr.bf16.mxu0 %v605_v0  ;;  %554 = vmatprep.subr.bf16.mxu1 %v605_v0 }
  0x2a   :  { %252 = vmatpush1.bf16.msra.mxu0 %v579_v13  ;;  %566 = vmatpush1.bf16.msra.mxu1 %v579_v13 }
  0x2b   :  { %253 = vmatprep.subr.bf16.mxu0 %v605_v0  ;;  %555 = vmatprep.subr.bf16.mxu1 %v605_v0 }
  0x2e   :  { %254 = vmatpush1.bf16.msra.mxu0 %v580_v14  ;;  %567 = vmatpush1.bf16.msra.mxu1 %v580_v14 }
  0x31   :  { %264 = vmatmul.mubr.bf16.vlgmr.msra.gmra.mrb[0].mxu0 %v581_v15  ;;  %296 = vmatmul.mubr.bf16.vlgmr.msra.gmra.mrb[0].mxu1 %v584_v16 }
  0x32   :  { %458 = vmatprep.mubr.msk.bf16.mxu0 %vm206_vm0, %v587_v17  ;;  %462 = vmatprep.mubr.msk.bf16.mxu1 %vm206_vm0, %v589_v18 }
  0x39   :  { %272 = vmatmul.mubr.bf16.gmra.mrb[4].mxu0 %v591_v19  ;;  %304 = vmatmul.mubr.bf16.gmra.mrb[4].mxu1 %v592_v20 }
  0x3a   :  { %459 = vmatprep.mubr.msk.bf16.mxu0 %vm206_vm0, %v593_v21  ;;  %463 = vmatprep.mubr.msk.bf16.mxu1 %vm206_vm0, %v595_v22 }
  0x41   :  { %280 = vmatmul.mubr.bf16.gmra.mrb[8].mxu0 %v597_v23  ;;  %312 = vmatmul.mubr.bf16.gmra.mrb[8].mxu1 %v598_v24 }
  0x42   :  { %460 = vmatprep.mubr.msk.bf16.mxu0 %vm206_vm0, %v599_v25  ;;  %464 = vmatprep.mubr.msk.bf16.mxu1 %vm206_vm0, %v601_v26 }
  0x49   :  { %288 = vmatmul.mubr.bf16.gmra.mrb[12].mxu0 %v603_v27  ;;  %320 = vmatmul.mubr.bf16.gmra.mrb[12].mxu1 %v604_v28 }
 0x104   :  { %v265_v30 = vpop.f32.mrb[0].mxu0  ;;  %v297_v31 = vpop.f32.mrb[0].mxu1 }
 0x105   :  { %v266_v32 = vadd.f32 %v745_v29, %v265_v30  ;;  %v298_v33 = vadd.f32 %v745_v29, %v297_v31  ;;  %v267_v34 = vpop.f32.mrb[1].mxu0  ;;  %v299_v35 = vpop.f32.mrb[1].mxu1 }
 0x106   :  { %v268_v36 = vpop.f32.mrb[2].mxu0  ;;  %v300_v37 = vpop.f32.mrb[2].mxu1 }
 0x107   :  { %v269_v38 = vadd.f32 %v745_v29, %v268_v36  ;;  %v301_v39 = vadd.f32 %v745_v29, %v300_v37  ;;  %v270_v40 = vpop.f32.mrb[3].mxu0  ;;  %v302_v41 = vpop.f32.mrb[3].mxu1  ;;  %v328_v42 = vmax.f32 %v266_v32, 0.0  ;;  %v336_v43 = vmax.f32 %v298_v33, 0.0 }
 0x109   :  { %v329_v44 = vmax.f32 %v269_v38, 0.0  ;;  %v337_v45 = vmax.f32 %v301_v39, 0.0 }
 0x10b   :  { %v500_v46 = vpack.c.bf16 %v329_v44, %v328_v42  ;;  %v520_v47 = vpack.c.bf16 %v337_v45, %v336_v43 }
 0x10c   :  { %v273_v48 = vpop.f32.mrb[4].mxu0  ;;  %v305_v49 = vpop.f32.mrb[4].mxu1 }
 0x10d   :  { %501 = vst [vmem:[%s790_s3] sm:$0xff] %v500_v46   ;;  %540 = vst [vmem:[%s790_s3 + $0x20] sm:$0xff] %v520_v47   ;;  %v274_v50 = vadd.f32 %v745_v29, %v273_v48  ;;  %v306_v51 = vadd.f32 %v745_v29, %v305_v49  ;;  %v275_v52 = vpop.f32.mrb[5].mxu0  ;;  %v307_v53 = vpop.f32.mrb[5].mxu1 }
 0x10e   :  { %v276_v54 = vpop.f32.mrb[6].mxu0  ;;  %v308_v55 = vpop.f32.mrb[6].mxu1 }
 0x10f   :  { %v277_v56 = vadd.f32 %v745_v29, %v276_v54  ;;  %v309_v57 = vadd.f32 %v745_v29, %v308_v55  ;;  %v278_v58 = vpop.f32.mrb[7].mxu0  ;;  %v310_v59 = vpop.f32.mrb[7].mxu1  ;;  %v330_v60 = vmax.f32 %v274_v50, 0.0  ;;  %v338_v61 = vmax.f32 %v306_v51, 0.0 }
 0x111   :  { %v331_v62 = vmax.f32 %v277_v56, 0.0  ;;  %v339_v63 = vmax.f32 %v309_v57, 0.0 }
 0x113   :  { %v505_v0 = vpack.c.bf16 %v331_v62, %v330_v60  ;;  %v525_v1 = vpack.c.bf16 %v339_v63, %v338_v61 }
 0x114   :  { %v281_v2 = vpop.f32.mrb[8].mxu0  ;;  %v313_v3 = vpop.f32.mrb[8].mxu1 }
 0x115   :  { %537 = vst [vmem:[%s790_s3 + $0x8] sm:$0xff] %v505_v0   ;;  %541 = vst [vmem:[%s790_s3 + $0x28] sm:$0xff] %v525_v1   ;;  %v282_v4 = vadd.f32 %v745_v29, %v281_v2  ;;  %v314_v5 = vadd.f32 %v745_v29, %v313_v3  ;;  %v283_v6 = vpop.f32.mrb[9].mxu0  ;;  %v315_v7 = vpop.f32.mrb[9].mxu1 }
 0x116   :  { %v284_v8 = vpop.f32.mrb[10].mxu0  ;;  %v316_v9 = vpop.f32.mrb[10].mxu1 }
 0x117   :  { %v285_v10 = vadd.f32 %v745_v29, %v284_v8  ;;  %v317_v11 = vadd.f32 %v745_v29, %v316_v9  ;;  %v286_v12 = vpop.f32.mrb[11].mxu0  ;;  %v318_v13 = vpop.f32.mrb[11].mxu1  ;;  %v332_v14 = vmax.f32 %v282_v4, 0.0  ;;  %v340_v15 = vmax.f32 %v314_v5, 0.0 }
 0x119   :  { %v333_v16 = vmax.f32 %v285_v10, 0.0  ;;  %v341_v17 = vmax.f32 %v317_v11, 0.0 }
 0x11b   :  { %v510_v18 = vpack.c.bf16 %v333_v16, %v332_v14  ;;  %v530_v19 = vpack.c.bf16 %v341_v17, %v340_v15 }
 0x11c   :  { %v289_v20 = vpop.f32.mrb[12].mxu0  ;;  %v321_v21 = vpop.f32.mrb[12].mxu1 }
 0x11d   :  { %538 = vst [vmem:[%s790_s3 + $0x10] sm:$0xff] %v510_v18   ;;  %542 = vst [vmem:[%s790_s3 + $0x30] sm:$0xff] %v530_v19   ;;  %v290_v22 = vadd.f32 %v745_v29, %v289_v20  ;;  %v322_v23 = vadd.f32 %v745_v29, %v321_v21  ;;  %v291_v24 = vpop.f32.mrb[13].mxu0  ;;  %v323_v25 = vpop.f32.mrb[13].mxu1 }
 0x11e   :  { %v292_v26 = vpop.f32.mrb[14].mxu0  ;;  %v324_v27 = vpop.f32.mrb[14].mxu1 }
 0x11f   :  { %v293_v28 = vadd.f32 %v745_v29, %v292_v26  ;;  %v325_v30 = vadd.f32 %v745_v29, %v324_v27  ;;  %v294_v31 = vpop.f32.mrb[15].mxu0  ;;  %v326_v32 = vpop.f32.mrb[15].mxu1  ;;  %v334_v33 = vmax.f32 %v290_v22, 0.0  ;;  %v342_v34 = vmax.f32 %v322_v23, 0.0 }
 0x121   :  { %v335_v35 = vmax.f32 %v293_v28, 0.0  ;;  %v343_v36 = vmax.f32 %v325_v30, 0.0 }
 0x123   :  { %v515_v37 = vpack.c.bf16 %v335_v35, %v334_v33  ;;  %v535_v38 = vpack.c.bf16 %v343_v36, %v342_v34 }
 0x125   :  { %539 = vst [vmem:[%s790_s3 + $0x18] sm:$0xff] %v515_v37   ;;  %543 = vst [vmem:[%s790_s3 + $0x38] sm:$0xff] %v535_v38  }

// kernel: conv_autoencoder_forward.10
= control target key start
LH: loop header
LB: loop body
LE: loop exit
PB: predicated region body
PF: predicated region fallthrough
CT: control target
= control target key end

     0   :  { %s639_s1 = inlined_call_operand.vmem [shape: bf16[384,128], index: 1, kind: input, shape index: {}]   ;;  %s640_s0 = inlined_call_operand.vmem [shape: bf16[32,384], index: 0, kind: input, shape index: {}]   ;;  %s641_s2 = inlined_call_operand.vmem [shape: f32[1,128], index: 2, kind: input, shape index: {}]   ;;  %s642_s3 = inlined_call_operand.vmem [shape: bf16[32,128], index: 3, kind: output, shape index: {}]  }
   0x1   :  { %v488_v0 = vld [vmem:[%s639_s1 + $0x40] sm:$0xff]   ;;  %v490_v2 = vld [vmem:[%s639_s1 + $0x48] sm:$0xff]   ;;  %v493_v5 = vld [vmem:[%s639_s1 + $0x50] sm:$0xff]  }
   0x2   :  { %v489_v1 = vld [vmem:[%s639_s1] sm:$0xff]   ;;  %430 = vmatprep.subr.bf16.mxu0 %v488_v0  ;;  %v492_v4 = vld [vmem:[%s639_s1 + $0x8] sm:$0xff]   ;;  %v495_v7 = vld [vmem:[%s639_s1 + $0x10] sm:$0xff]  }
   0x3   :  { %431 = vmatpush3.bf16.msra.mxu0 %v489_v1  ;;  %v491_v3 = vld [vmem:[%s639_s1 + $0x80] sm:$0xff]   ;;  %v494_v6 = vld [vmem:[%s639_s1 + $0x88] sm:$0xff]   ;;  %v496_v8 = vld [vmem:[%s639_s1 + $0x58] sm:$0xff]  }
   0x4   :  { %432 = vmatprep.subr.bf16.mxu0 %v490_v2  ;;  %468 = vmatprep.subr.bf16.mxu1 %v491_v3  ;;  %v497_v9 = vld [vmem:[%s639_s1 + $0x90] sm:$0xff]   ;;  %v498_v10 = vld [vmem:[%s639_s1 + $0x18] sm:$0xff]   ;;  %v499_v11 = vld [vmem:[%s639_s1 + $0x60] sm:$0xff]  }
   0x5   :  { %469 = vmatpush3.bf16.msra.mxu1 %v491_v3  ;;  %v500_v12 = vld [vmem:[%s639_s1 + $0x98] sm:$0xff]   ;;  %v501_v13 = vld [vmem:[%s639_s1 + $0x20] sm:$0xff]   ;;  %v502_v15 = vld [vmem:[%s639_s1 + $0x68] sm:$0xff]  }
   0x6   :  { %470 = vmatprep.subr.bf16.mxu1 %v494_v6  ;;  %v503_v14 = vld [vmem:[%s639_s1 + $0xa0] sm:$0xff]   ;;  %v504_v16 = vld [vmem:[%s639_s1 + $0x28] sm:$0xff]   ;;  %v505_v18 = vld [vmem:[%s639_s1 + $0x70] sm:$0xff]  }
   0x7   :  { %433 = vmatpush3.bf16.msra.mxu0 %v492_v4  ;;  %v506_v17 = vld [vmem:[%s639_s1 + $0xa8] sm:$0xff]   ;;  %v507_v19 = vld [vmem:[%s639_s1 + $0x30] sm:$0xff]   ;;  %v508_v20 = vld [vmem:[%s639_s1 + $0x78] sm:$0xff]  }
   0x8   :  { %434 = vmatprep.subr.bf16.mxu0 %v493_v5  ;;  %v509_v21 = vld [vmem:[%s639_s1 + $0xb0] sm:$0xff]   ;;  %v510_v23 = vld [vmem:[%s639_s1 + $0x38] sm:$0xff]   ;;  %v511_v26 = vld [vmem:[%s640_s0] ss:$12 sps:$4 sm:$0xff]  }
   0x9   :  { %471 = vmatpush3.bf16.msra.mxu1 %v494_v6  ;;  %v513_v22 = vld [vmem:[%s640_s0 + $0x4] ss:$12 sps:$4 sm:$0xff]   ;;  %v515_v24 = vld [vmem:[%s640_s0 + $0x8] ss:$12 sps:$4 sm:$0xff]   ;;  %v514_v25 = vld [vmem:[%s639_s1 + $0xb8] sm:$0xff]  }
   0xa   :  { %472 = vmatprep.subr.bf16.mxu1 %v497_v9  ;;  %286 = vmatprep.mubr.bf16.mxu0 %v513_v22  ;;  %v517_v27 = vld [vmem:[%s640_s0 + $0x1c] ss:$12 sps:$4 sm:$0xff]   ;;  %v516_v28 = vld [vmem:[%s640_s0 + $0x20] ss:$12 sps:$4 sm:$0xff]   ;;  %v519_v29 = vld [vmem:[%s640_s0 + $0x18] ss:$12 sps:$4 sm:$0xff]  }
   0xb   :  { %435 = vmatpush3.bf16.msra.mxu0 %v495_v7  ;;  %484 = vmatprep.mubr.bf16.mxu1 %v515_v24  ;;  %v380_v32 = vld [vmem:[%s641_s2] ss:$0 sm:$0xff] }
   0xc   :  { %436 = vmatprep.subr.bf16.mxu0 %v496_v8 }
   0xd   :  { %473 = vmatpush3.bf16.msra.mxu1 %v497_v9 }
   0xe   :  { %474 = vmatprep.subr.bf16.mxu1 %v500_v12 }
   0xf   :  { %437 = vmatpush3.bf16.msra.mxu0 %v498_v10 }
  0x10   :  { %438 = vmatprep.subr.bf16.mxu0 %v499_v11 }
  0x11   :  { %475 = vmatpush3.bf16.msra.mxu1 %v500_v12 }
  0x12   :  { %476 = vmatprep.subr.bf16.mxu1 %v503_v14 }
  0x13   :  { %439 = vmatpush3.bf16.msra.mxu0 %v501_v13 }
  0x14   :  { %440 = vmatprep.subr.bf16.mxu0 %v502_v15 }
  0x15   :  { %477 = vmatpush3.bf16.msra.mxu1 %v503_v14 }
  0x16   :  { %478 = vmatprep.subr.bf16.mxu1 %v506_v17 }
  0x17   :  { %441 = vmatpush3.bf16.msra.mxu0 %v504_v16 }
  0x18   :  { %442 = vmatprep.subr.bf16.mxu0 %v505_v18 }
  0x19   :  { %479 = vmatpush3.bf16.msra.mxu1 %v506_v17 }
  0x1a   :  { %480 = vmatprep.subr.bf16.mxu1 %v509_v21 }
  0x1b   :  { %443 = vmatpush3.bf16.msra.mxu0 %v507_v19 }
  0x1c   :  { %444 = vmatprep.subr.bf16.mxu0 %v508_v20 }
  0x1d   :  { %481 = vmatpush3.bf16.msra.mxu1 %v509_v21 }
  0x1e   :  { %482 = vmatprep.subr.bf16.mxu1 %v514_v25 }
  0x1f   :  { %445 = vmatpush3.bf16.msra.mxu0 %v510_v23 }
  0x21   :  { %483 = vmatpush3.bf16.msra.mxu1 %v514_v25 }
  0x22   :  { %287 = vmatmul.mubr.bf16.vlgmr.msra.gmra.mrb[0].mxu0 %v511_v26 }
  0x23   :  { %294 = vmatprep.mubr.bf16.mxu0 %v517_v27 }
  0x24   :  { %485 = vmatmul.mubr.bf16.vlgmr.msra.gmra.mrb[0].mxu1 %v516_v28 }
  0x2a   :  { %295 = vmatmul.mubr.bf16.gmra.mrb[4].mxu0 %v519_v29 }
  0xf5   :  { %v446_v30 = vpop.f32.mrb[0].mxu0 }
  0xf6   :  { %v447_v31 = vpop.f32.mrb[1].mxu0 }
  0xf7   :  { %v448_v33 = vadd.f32 %v447_v31, %v446_v30  ;;  %v449_v34 = vpop.f32.mrb[2].mxu0  ;;  %v486_v36 = vpop.f32.mrb[0].mxu1 }
  0xf8   :  { %v450_v35 = vpop.f32.mrb[3].mxu0  ;;  %v337_v39 = vpop.f32.mrb[1].mxu1 }
  0xf9   :  { %v451_v37 = vadd.f32 %v450_v35, %v449_v34  ;;  %v289_v38 = vadd.f32 %v448_v33, %v380_v32  ;;  %v487_v40 = vpop.f32.mrb[2].mxu1 }
  0xfa   :  { %v340_v43 = vpop.f32.mrb[3].mxu1 }
  0xfb   :  { %v338_v41 = vadd.f32 %v337_v39, %v289_v38  ;;  %v292_v42 = vadd.f32 %v451_v37, %v380_v32 }
  0xfd   :  { %v341_v44 = vadd.f32 %v340_v43, %v292_v42  ;;  %v452_v45 = vpop.f32.mrb[4].mxu0  ;;  %v352_v47 = vmax.f32 %v338_v41, 0.0 }
  0xfe   :  { %v453_v46 = vpop.f32.mrb[5].mxu0 }
  0xff   :  { %v353_v48 = vmax.f32 %v341_v44, 0.0  ;;  %v454_v49 = vadd.f32 %v453_v46, %v452_v45  ;;  %v455_v50 = vpop.f32.mrb[6].mxu0 }
 0x100   :  { %v456_v51 = vpop.f32.mrb[7].mxu0 }
 0x101   :  { %v422_v52 = vpack.c.bf16 %v353_v48, %v352_v47  ;;  %v297_v53 = vadd.f32 %v454_v49, %v380_v32  ;;  %v457_v54 = vadd.f32 %v456_v51, %v455_v50 }
 0x103   :  { %423 = vst [vmem:[%s642_s3] sm:$0xff] %v422_v52   ;;  %v346_v55 = vadd.f32 %v486_v36, %v297_v53  ;;  %v300_v56 = vadd.f32 %v457_v54, %v380_v32 }
 0x105   :  { %v349_v57 = vadd.f32 %v487_v40, %v300_v56  ;;  %v354_v58 = vmax.f32 %v346_v55, 0.0 }
 0x107   :  { %v355_v59 = vmax.f32 %v349_v57, 0.0 }
 0x109   :  { %v427_v60 = vpack.c.bf16 %v355_v59, %v354_v58 }
 0x10b   :  { %429 = vst [vmem:[%s642_s3 + $0x8] sm:$0xff] %v427_v60  }

// kernel: conv_autoencoder_forward.11
= control target key start
LH: loop header
LB: loop body
LE: loop exit
PB: predicated region body
PF: predicated region fallthrough
CT: control target
= control target key end

     0   :  { %s911_s1 = inlined_call_operand.vmem [shape: bf16[768,128], index: 1, kind: input, shape index: {}]   ;;  %s912_s0 = inlined_call_operand.vmem [shape: bf16[8,768], index: 0, kind: input, shape index: {}]   ;;  %s913_s2 = inlined_call_operand.vmem [shape: f32[1,128], index: 2, kind: input, shape index: {}]   ;;  %s914_s3 = inlined_call_operand.vmem [shape: bf16[8,128], index: 3, kind: output, shape index: {}]  }
   0x1   :  { %v678_v0 = vld [vmem:[%s911_s1 + $0x40] sm:$0xff]   ;;  %v682_v4 = vld [vmem:[%s911_s1 + $0x48] sm:$0xff]   ;;  %v686_v8 = vld [vmem:[%s911_s1 + $0x50] sm:$0xff]  }
   0x2   :  { %v679_v1 = vld [vmem:[%s911_s1] sm:$0xff]   ;;  %612 = vmatprep.subr.bf16.mxu0 %v678_v0  ;;  %v683_v5 = vld [vmem:[%s911_s1 + $0x8] sm:$0xff]   ;;  %v687_v9 = vld [vmem:[%s911_s1 + $0x10] sm:$0xff]  }
   0x3   :  { %v680_v2 = vld [vmem:[%s911_s1 + $0xc0] sm:$0xff]   ;;  %613 = vmatpush3.bf16.msra.mxu0 %v679_v1  ;;  %v684_v6 = vld [vmem:[%s911_s1 + $0xc8] sm:$0xff]   ;;  %v688_v10 = vld [vmem:[%s911_s1 + $0xd0] sm:$0xff]  }
   0x4   :  { %v681_v3 = vld [vmem:[%s911_s1 + $0x80] sm:$0xff]   ;;  %634 = vmatprep.subr.bf16.mxu1 %v680_v2  ;;  %614 = vmatprep.subr.bf16.mxu0 %v682_v4  ;;  %v685_v7 = vld [vmem:[%s911_s1 + $0x88] sm:$0xff]   ;;  %v689_v11 = vld [vmem:[%s911_s1 + $0x90] sm:$0xff]  }
   0x5   :  { %635 = vmatpush3.bf16.msra.mxu1 %v681_v3  ;;  %v690_v12 = vld [vmem:[%s911_s1 + $0x58] sm:$0xff]   ;;  %v694_v16 = vld [vmem:[%s911_s1 + $0x60] sm:$0xff]   ;;  %v698_v20 = vld [vmem:[%s911_s1 + $0x68] sm:$0xff]  }
   0x6   :  { %636 = vmatprep.subr.bf16.mxu1 %v684_v6  ;;  %v691_v13 = vld [vmem:[%s911_s1 + $0x18] sm:$0xff]   ;;  %v695_v17 = vld [vmem:[%s911_s1 + $0x20] sm:$0xff]   ;;  %v699_v21 = vld [vmem:[%s911_s1 + $0x28] sm:$0xff]  }
   0x7   :  { %615 = vmatpush3.bf16.msra.mxu0 %v683_v5  ;;  %v692_v14 = vld [vmem:[%s911_s1 + $0xd8] sm:$0xff]   ;;  %v696_v18 = vld [vmem:[%s911_s1 + $0xe0] sm:$0xff]   ;;  %v700_v22 = vld [vmem:[%s911_s1 + $0xe8] sm:$0xff]  }
   0x8   :  { %616 = vmatprep.subr.bf16.mxu0 %v686_v8  ;;  %v693_v15 = vld [vmem:[%s911_s1 + $0x98] sm:$0xff]   ;;  %v697_v19 = vld [vmem:[%s911_s1 + $0xa0] sm:$0xff]   ;;  %v701_v23 = vld [vmem:[%s911_s1 + $0xa8] sm:$0xff]  }
   0x9   :  { %637 = vmatpush3.bf16.msra.mxu1 %v685_v7  ;;  %v702_v24 = vld [vmem:[%s911_s1 + $0x70] sm:$0xff]   ;;  %v706_v28 = vld [vmem:[%s911_s1 + $0x78] sm:$0xff]   ;;  %v15_v31 = vld [vmem:[%s912_s0] sm:$0xff] }
   0xa   :  { %638 = vmatprep.subr.bf16.mxu1 %v688_v10  ;;  %v703_v25 = vld [vmem:[%s911_s1 + $0x30] sm:$0xff]   ;;  %v707_v29 = vld [vmem:[%s911_s1 + $0x38] sm:$0xff]   ;;  %v558_v32 = vcombine.low %v15_v31, %v15_v31  ;;  %v559_v33 = vcombine.high %v15_v31, %v15_v31  ;;  %v712_v35 = vld [vmem:[%s911_s1 + $0x140] sm:$0xff]  }
   0xb   :  { %617 = vmatpush3.bf16.msra.mxu0 %v687_v9  ;;  %v704_v26 = vld [vmem:[%s911_s1 + $0xf0] sm:$0xff]   ;;  %v708_v30 = vld [vmem:[%s911_s1 + $0xf8] sm:$0xff]   ;;  %v16_v36 = vld [vmem:[%s912_s0 + $0x8] sm:$0xff] }
   0xc   :  { %618 = vmatprep.subr.bf16.mxu0 %v690_v12  ;;  %v705_v27 = vld [vmem:[%s911_s1 + $0xb0] sm:$0xff]   ;;  %v711_v34 = vld [vmem:[%s911_s1 + $0xb8] sm:$0xff]   ;;  %462 = vmatprep.mubr.bf16.mxu0 %v559_v33  ;;  %v560_v37 = vcombine.low %v16_v36, %v16_v36  ;;  %v561_v38 = vcombine.high %v16_v36, %v16_v36  ;;  %v715_v39 = vld [vmem:[%s911_s1 + $0x100] sm:$0xff]  }
   0xd   :  { %639 = vmatpush3.bf16.msra.mxu1 %v689_v11  ;;  %v716_v40 = vld [vmem:[%s911_s1 + $0x148] sm:$0xff]   ;;  %v718_v42 = vld [vmem:[%s911_s1 + $0x150] sm:$0xff]   ;;  %v720_v44 = vld [vmem:[%s911_s1 + $0x158] sm:$0xff]  }
   0xe   :  { %640 = vmatprep.subr.bf16.mxu1 %v692_v14  ;;  %502 = vmatprep.mubr.bf16.mxu1 %v561_v38  ;;  %v717_v41 = vld [vmem:[%s911_s1 + $0x108] sm:$0xff]   ;;  %v719_v43 = vld [vmem:[%s911_s1 + $0x110] sm:$0xff]   ;;  %v721_v45 = vld [vmem:[%s911_s1 + $0x118] sm:$0xff]  }
   0xf   :  { %619 = vmatpush3.bf16.msra.mxu0 %v691_v13  ;;  %v722_v46 = vld [vmem:[%s911_s1 + $0x160] sm:$0xff]   ;;  %v17_v48 = vld [vmem:[%s912_s0 + $0x10] sm:$0xff]  ;;  %v724_v49 = vld [vmem:[%s911_s1 + $0x168] sm:$0xff]  }
  0x10   :  { %620 = vmatprep.subr.bf16.mxu0 %v694_v16  ;;  %v723_v47 = vld [vmem:[%s911_s1 + $0x120] sm:$0xff]   ;;  %v563_v50 = vcombine.high %v17_v48, %v17_v48  ;;  %v725_v51 = vld [vmem:[%s911_s1 + $0x128] sm:$0xff]   ;;  %v726_v52 = vld [vmem:[%s911_s1 + $0x170] sm:$0xff]   ;;  %v562_v56 = vcombine.low %v17_v48, %v17_v48 }
  0x11   :  { %641 = vmatpush3.bf16.msra.mxu1 %v693_v15  ;;  %v727_v53 = vld [vmem:[%s911_s1 + $0x130] sm:$0xff]   ;;  %v728_v54 = vld [vmem:[%s911_s1 + $0x178] sm:$0xff]   ;;  %v557_v58 = vld [vmem:[%s913_s2] ss:$0 sm:$0xff] }
  0x12   :  { %642 = vmatprep.subr.bf16.mxu1 %v696_v18  ;;  %v729_v55 = vld [vmem:[%s911_s1 + $0x138] sm:$0xff]  }
  0x13   :  { %621 = vmatpush3.bf16.msra.mxu0 %v695_v17 }
  0x14   :  { %622 = vmatprep.subr.bf16.mxu0 %v698_v20 }
  0x15   :  { %643 = vmatpush3.bf16.msra.mxu1 %v697_v19 }
  0x16   :  { %644 = vmatprep.subr.bf16.mxu1 %v700_v22 }
  0x17   :  { %623 = vmatpush3.bf16.msra.mxu0 %v699_v21 }
  0x18   :  { %624 = vmatprep.subr.bf16.mxu0 %v702_v24 }
  0x19   :  { %645 = vmatpush3.bf16.msra.mxu1 %v701_v23 }
  0x1a   :  { %646 = vmatprep.subr.bf16.mxu1 %v704_v26 }
  0x1b   :  { %625 = vmatpush3.bf16.msra.mxu0 %v703_v25 }
  0x1c   :  { %626 = vmatprep.subr.bf16.mxu0 %v706_v28 }
  0x1d   :  { %647 = vmatpush3.bf16.msra.mxu1 %v705_v27 }
  0x1e   :  { %648 = vmatprep.subr.bf16.mxu1 %v708_v30 }
  0x1f   :  { %627 = vmatpush3.bf16.msra.mxu0 %v707_v29 }
  0x20   :  { %656 = vmatprep.subr.bf16.mxu0 %v712_v35 }
  0x21   :  { %649 = vmatpush3.bf16.msra.mxu1 %v711_v34 }
  0x22   :  { %463 = vmatmul.mubr.bf16.vlgmr.msra.gmra.mrb[0].mxu0 %v558_v32 }
  0x23   :  { %657 = vmatpush3.bf16.msra.mxu0 %v715_v39  ;;  %542 = vmatprep.mubr.bf16.mxu0 %v563_v50 }
  0x24   :  { %503 = vmatmul.mubr.bf16.vlgmr.msra.gmra.mrb[0].mxu1 %v560_v37  ;;  %658 = vmatprep.subr.bf16.mxu0 %v716_v40 }
  0x27   :  { %659 = vmatpush3.bf16.msra.mxu0 %v717_v41 }
  0x28   :  { %660 = vmatprep.subr.bf16.mxu0 %v718_v42 }
  0x2b   :  { %661 = vmatpush3.bf16.msra.mxu0 %v719_v43 }
  0x2c   :  { %662 = vmatprep.subr.bf16.mxu0 %v720_v44 }
  0x2f   :  { %663 = vmatpush3.bf16.msra.mxu0 %v721_v45 }
  0x30   :  { %664 = vmatprep.subr.bf16.mxu0 %v722_v46 }
  0x33   :  { %665 = vmatpush3.bf16.msra.mxu0 %v723_v47 }
  0x34   :  { %666 = vmatprep.subr.bf16.mxu0 %v724_v49 }
  0x37   :  { %667 = vmatpush3.bf16.msra.mxu0 %v725_v51 }
  0x38   :  { %668 = vmatprep.subr.bf16.mxu0 %v726_v52 }
  0x3b   :  { %669 = vmatpush3.bf16.msra.mxu0 %v727_v53 }
  0x3c   :  { %670 = vmatprep.subr.bf16.mxu0 %v728_v54 }
  0x3f   :  { %671 = vmatpush3.bf16.msra.mxu0 %v729_v55 }
  0x42   :  { %543 = vmatmul.mubr.bf16.vlgmr.msra.gmra.mrb[4].mxu0 %v562_v56 }
  0xf5   :  { %v628_v57 = vpop.f32.mrb[0].mxu0 }
  0xf6   :  { %v629_v59 = vpop.f32.mrb[1].mxu0 }
  0xf7   :  { %v630_v60 = vadd.f32 %v629_v59, %v628_v57  ;;  %v631_v61 = vpop.f32.mrb[2].mxu0  ;;  %v650_v62 = vpop.f32.mrb[0].mxu1 }
  0xf8   :  { %v632_v63 = vpop.f32.mrb[3].mxu0  ;;  %v651_v0 = vpop.f32.mrb[1].mxu1 }
  0xf9   :  { %v465_v1 = vadd.f32 %v630_v60, %v557_v58  ;;  %v652_v2 = vadd.f32 %v651_v0, %v650_v62  ;;  %v653_v3 = vpop.f32.mrb[2].mxu1 }
  0xfa   :  { %v654_v4 = vpop.f32.mrb[3].mxu1 }
  0xfb   :  { %v505_v5 = vadd.f32 %v652_v2, %v465_v1 }
 0x115   :  { %v672_v6 = vpop.f32.mrb[4].mxu0 }
 0x116   :  { %v673_v7 = vpop.f32.mrb[5].mxu0 }
 0x117   :  { %v674_v8 = vadd.f32 %v673_v7, %v672_v6  ;;  %v675_v9 = vpop.f32.mrb[6].mxu0 }
 0x118   :  { %v676_v10 = vpop.f32.mrb[7].mxu0 }
 0x119   :  { %v545_v11 = vadd.f32 %v674_v8, %v505_v5 }
 0x11b   :  { %v550_v12 = vmax.f32 %v545_v11, 0.0 }
 0x11d   :  { %v551_v13 = vpack.c.bf16 %v550_v12, %v550_v12 }
 0x11f   :  { %552 = vst [vmem:[%s914_s3] sm:$0xf] %v551_v13 }

// kernel: conv_autoencoder_forward.12
= control target key start
LH: loop header
LB: loop body
LE: loop exit
PB: predicated region body
PF: predicated region fallthrough
CT: control target
= control target key end

     0   :  { %vm703_vm0 = vcmask 785408   ;;  %s1561_s1 = inlined_call_operand.vmem [shape: bf16[864,256], index: 1, kind: input, shape index: {}]   ;;  %s1562_s0 = inlined_call_operand.vmem [shape: bf16[8,864], index: 0, kind: input, shape index: {}]   ;;  %s1563_s2 = inlined_call_operand.vmem [shape: f32[1,256], index: 2, kind: input, shape index: {}]   ;;  %s1564_s3 = inlined_call_operand.vmem [shape: bf16[8,256], index: 3, kind: output, shape index: {}]  }
   0x1   :  { %v1017_v0 = vld [vmem:[%s1561_s1 + $0x4] ss:$8 sps:$4 sm:$0xff]   ;;  %v1019_v1 = vld [vmem:[%s1561_s1] ss:$8 sps:$4 sm:$0xff]   ;;  %v1020_v2 = vld [vmem:[%s1561_s1 + $0x14] ss:$8 sps:$4 sm:$0xff]  }
   0x2   :  { %707 = vmatprep.subr.bf16.mxu1 %v1017_v0  ;;  %v1022_v3 = vld [vmem:[%s1561_s1 + $0x10] ss:$8 sps:$4 sm:$0xff]   ;;  %v1023_v4 = vld [vmem:[%s1561_s1 + $0x24] ss:$8 sps:$4 sm:$0xff]   ;;  %v1025_v5 = vld [vmem:[%s1561_s1 + $0x20] ss:$8 sps:$4 sm:$0xff]  }
   0x3   :  { %708 = vmatpush1.bf16.msra.mxu1 %v1019_v1  ;;  %v1031_v6 = vld [vmem:[%s1561_s1 + $0x204] ss:$8 sps:$4 sm:$0xff]   ;;  %v1034_v7 = vld [vmem:[%s1561_s1 + $0x200] ss:$8 sps:$4 sm:$0xff]   ;;  %v1026_v8 = vld [vmem:[%s1561_s1 + $0x34] ss:$8 sps:$4 sm:$0xff]  }
   0x4   :  { %709 = vmatprep.subr.bf16.mxu1 %v1020_v2  ;;  %789 = vmatprep.subr.bf16.mxu0 %v1031_v6  ;;  %v1037_v9 = vld [vmem:[%s1561_s1 + $0x214] ss:$8 sps:$4 sm:$0xff]   ;;  %v1040_v10 = vld [vmem:[%s1561_s1 + $0x210] ss:$8 sps:$4 sm:$0xff]   ;;  %v1029_v12 = vld [vmem:[%s1561_s1 + $0x44] ss:$8 sps:$4 sm:$0xff]  }
   0x5   :  { %790 = vmatpush1.bf16.msra.mxu0 %v1034_v7  ;;  %v1028_v11 = vld [vmem:[%s1561_s1 + $0x30] ss:$8 sps:$4 sm:$0xff]   ;;  %v1043_v13 = vld [vmem:[%s1561_s1 + $0x224] ss:$8 sps:$4 sm:$0xff]   ;;  %v1046_v14 = vld [vmem:[%s1561_s1 + $0x220] ss:$8 sps:$4 sm:$0xff]  }
   0x6   :  { %791 = vmatprep.subr.bf16.mxu0 %v1037_v9  ;;  %v1033_v15 = vld [vmem:[%s1561_s1 + $0x40] ss:$8 sps:$4 sm:$0xff]   ;;  %v1049_v16 = vld [vmem:[%s1561_s1 + $0x234] ss:$8 sps:$4 sm:$0xff]   ;;  %v1039_v18 = vld [vmem:[%s1561_s1 + $0x50] ss:$8 sps:$4 sm:$0xff]  }
   0x7   :  { %710 = vmatpush1.bf16.msra.mxu1 %v1022_v3  ;;  %v1035_v17 = vld [vmem:[%s1561_s1 + $0x54] ss:$8 sps:$4 sm:$0xff]   ;;  %v1052_v19 = vld [vmem:[%s1561_s1 + $0x230] ss:$8 sps:$4 sm:$0xff]   ;;  %v1055_v20 = vld [vmem:[%s1561_s1 + $0x244] ss:$8 sps:$4 sm:$0xff]  }
   0x8   :  { %711 = vmatprep.subr.bf16.mxu1 %v1023_v4  ;;  %v1041_v21 = vld [vmem:[%s1561_s1 + $0x64] ss:$8 sps:$4 sm:$0xff]   ;;  %v1058_v22 = vld [vmem:[%s1561_s1 + $0x240] ss:$8 sps:$4 sm:$0xff]   ;;  %v1061_v24 = vld [vmem:[%s1561_s1 + $0x254] ss:$8 sps:$4 sm:$0xff]  }
   0x9   :  { %792 = vmatpush1.bf16.msra.mxu0 %v1040_v10  ;;  %v1045_v23 = vld [vmem:[%s1561_s1 + $0x60] ss:$8 sps:$4 sm:$0xff]   ;;  %v1047_v25 = vld [vmem:[%s1561_s1 + $0x74] ss:$8 sps:$4 sm:$0xff]   ;;  %v1051_v26 = vld [vmem:[%s1561_s1 + $0x70] ss:$8 sps:$4 sm:$0xff]  }
   0xa   :  { %793 = vmatprep.subr.bf16.mxu0 %v1043_v13  ;;  %v1064_v27 = vld [vmem:[%s1561_s1 + $0x250] ss:$8 sps:$4 sm:$0xff]   ;;  %v1067_v28 = vld [vmem:[%s1561_s1 + $0x264] ss:$8 sps:$4 sm:$0xff]   ;;  %v1070_v30 = vld [vmem:[%s1561_s1 + $0x260] ss:$8 sps:$4 sm:$0xff]  }
   0xb   :  { %712 = vmatpush1.bf16.msra.mxu1 %v1025_v5  ;;  %v1053_v29 = vld [vmem:[%s1561_s1 + $0x84] ss:$8 sps:$4 sm:$0xff]   ;;  %v1057_v31 = vld [vmem:[%s1561_s1 + $0x80] ss:$8 sps:$4 sm:$0xff]   ;;  %v1073_v32 = vld [vmem:[%s1561_s1 + $0x274] ss:$8 sps:$4 sm:$0xff]  }
   0xc   :  { %713 = vmatprep.subr.bf16.mxu1 %v1026_v8  ;;  %v1059_v33 = vld [vmem:[%s1561_s1 + $0x94] ss:$8 sps:$4 sm:$0xff]   ;;  %v1063_v34 = vld [vmem:[%s1561_s1 + $0x90] ss:$8 sps:$4 sm:$0xff]   ;;  %v1079_v36 = vld [vmem:[%s1561_s1 + $0x284] ss:$8 sps:$4 sm:$0xff]  }
   0xd   :  { %794 = vmatpush1.bf16.msra.mxu0 %v1046_v14  ;;  %v1076_v35 = vld [vmem:[%s1561_s1 + $0x270] ss:$8 sps:$4 sm:$0xff]   ;;  %v1065_v37 = vld [vmem:[%s1561_s1 + $0xa4] ss:$8 sps:$4 sm:$0xff]   ;;  %v1082_v39 = vld [vmem:[%s1561_s1 + $0x280] ss:$8 sps:$4 sm:$0xff]  }
   0xe   :  { %795 = vmatprep.subr.bf16.mxu0 %v1049_v16  ;;  %v1324_v38 = vld [vmem:[%s1562_s0] sm:$0xff]  ;;  %v1085_v42 = vld [vmem:[%s1561_s1 + $0x294] ss:$8 sps:$4 sm:$0xff]   ;;  %v1088_v44 = vld [vmem:[%s1561_s1 + $0x290] ss:$8 sps:$4 sm:$0xff]  }
   0xf   :  { %714 = vmatpush1.bf16.msra.mxu1 %v1028_v11  ;;  %v887_v40 = vcombine.high %v1324_v38, %v1324_v38  ;;  %v1069_v41 = vld [vmem:[%s1561_s1 + $0xa0] ss:$8 sps:$4 sm:$0xff]   ;;  %v1071_v43 = vld [vmem:[%s1561_s1 + $0xb4] ss:$8 sps:$4 sm:$0xff]   ;;  %v1075_v45 = vld [vmem:[%s1561_s1 + $0xb0] ss:$8 sps:$4 sm:$0xff]   ;;  %v886_v2 = vcombine.low %v1324_v38, %v1324_v38 }
  0x10   :  { %715 = vmatprep.subr.bf16.mxu1 %v1029_v12  ;;  %v1091_v46 = vld [vmem:[%s1561_s1 + $0x2a4] ss:$8 sps:$4 sm:$0xff]   ;;  %v1094_v48 = vld [vmem:[%s1561_s1 + $0x2a0] ss:$8 sps:$4 sm:$0xff]   ;;  %v1097_v50 = vld [vmem:[%s1561_s1 + $0x2b4] ss:$8 sps:$4 sm:$0xff]  }
  0x11   :  { %796 = vmatpush1.bf16.msra.mxu0 %v1052_v19  ;;  %739 = vmatprep.mubr.bf16.mxu1 %v887_v40  ;;  %v1077_v47 = vld [vmem:[%s1561_s1 + $0xc4] ss:$8 sps:$4 sm:$0xff]   ;;  %v1081_v49 = vld [vmem:[%s1561_s1 + $0xc0] ss:$8 sps:$4 sm:$0xff]   ;;  %v1083_v51 = vld [vmem:[%s1561_s1 + $0xd4] ss:$8 sps:$4 sm:$0xff]  }
  0x12   :  { %797 = vmatprep.subr.bf16.mxu0 %v1055_v20  ;;  %v1100_v52 = vld [vmem:[%s1561_s1 + $0x2b0] ss:$8 sps:$4 sm:$0xff]   ;;  %v1107_v55 = vld [vmem:[%s1561_s1 + $0x2c4] ss:$8 sps:$4 sm:$0xff]   ;;  %v1109_v58 = vld [vmem:[%s1561_s1 + $0x2c0] ss:$8 sps:$4 sm:$0xff]  }
  0x13   :  { %716 = vmatpush1.bf16.msra.mxu1 %v1033_v15  ;;  %v17_v53 = vld [vmem:[%s1562_s0 + $0x10] sm:$0xff]  ;;  %v1089_v57 = vld [vmem:[%s1561_s1 + $0xe4] ss:$8 sps:$4 sm:$0xff]   ;;  %v1093_v59 = vld [vmem:[%s1561_s1 + $0xe0] ss:$8 sps:$4 sm:$0xff]  }
  0x14   :  { %717 = vmatprep.subr.bf16.mxu1 %v1035_v17  ;;  %v1087_v54 = vld [vmem:[%s1561_s1 + $0xd0] ss:$8 sps:$4 sm:$0xff]   ;;  %v891_v56 = vcombine.high %v17_v53, %v17_v53  ;;  %v1113_v60 = vld [vmem:[%s1561_s1 + $0x2d4] ss:$8 sps:$4 sm:$0xff]   ;;  %v1119_v0 = vld [vmem:[%s1561_s1 + $0x2e4] ss:$8 sps:$4 sm:$0xff]   ;;  %v890_v11 = vcombine.low %v17_v53, %v17_v53 }
  0x15   :  { %798 = vmatpush1.bf16.msra.mxu0 %v1058_v22  ;;  %v1095_v61 = vld [vmem:[%s1561_s1 + $0xf4] ss:$8 sps:$4 sm:$0xff]   ;;  %v1115_v62 = vld [vmem:[%s1561_s1 + $0x2d0] ss:$8 sps:$4 sm:$0xff]   ;;  %v1106_v1 = vld [vmem:[%s1561_s1 + $0x104] ss:$8 sps:$4 sm:$0xff]  }
  0x16   :  { %799 = vmatprep.subr.bf16.mxu0 %v1061_v24  ;;  %821 = vmatprep.mubr.bf16.mxu0 %v891_v56  ;;  %v1099_v63 = vld [vmem:[%s1561_s1 + $0xf0] ss:$8 sps:$4 sm:$0xff]   ;;  %v1121_v3 = vld [vmem:[%s1561_s1 + $0x2e0] ss:$8 sps:$4 sm:$0xff]   ;;  %v1125_v5 = vld [vmem:[%s1561_s1 + $0x2f4] ss:$8 sps:$4 sm:$0xff]  }
  0x17   :  { %718 = vmatpush1.bf16.msra.mxu1 %v1039_v18  ;;  %v1104_v4 = vld [vmem:[%s1561_s1 + $0x100] ss:$8 sps:$4 sm:$0xff]   ;;  %v1112_v6 = vld [vmem:[%s1561_s1 + $0x114] ss:$8 sps:$4 sm:$0xff]   ;;  %v1127_v7 = vld [vmem:[%s1561_s1 + $0x2f0] ss:$8 sps:$4 sm:$0xff]  }
  0x18   :  { %719 = vmatprep.subr.bf16.mxu1 %v1041_v21  ;;  %v1110_v8 = vld [vmem:[%s1561_s1 + $0x110] ss:$8 sps:$4 sm:$0xff]   ;;  %v1135_v9 = vld [vmem:[%s1561_s1 + $0x304] ss:$8 sps:$4 sm:$0xff]   ;;  %v1133_v12 = vld [vmem:[%s1561_s1 + $0x300] ss:$8 sps:$4 sm:$0xff]  }
  0x19   :  { %800 = vmatpush1.bf16.msra.mxu0 %v1064_v27  ;;  %v1118_v10 = vld [vmem:[%s1561_s1 + $0x124] ss:$8 sps:$4 sm:$0xff]   ;;  %v1116_v13 = vld [vmem:[%s1561_s1 + $0x120] ss:$8 sps:$4 sm:$0xff]   ;;  %v1141_v14 = vld [vmem:[%s1561_s1 + $0x314] ss:$8 sps:$4 sm:$0xff]  }
  0x1a   :  { %801 = vmatprep.subr.bf16.mxu0 %v1067_v28  ;;  %v1124_v15 = vld [vmem:[%s1561_s1 + $0x134] ss:$8 sps:$4 sm:$0xff]   ;;  %v1444_v16 = vld [vmem:[%s1562_s0 + $0x8] sm:$0xff]  ;;  %v1139_v17 = vld [vmem:[%s1561_s1 + $0x310] ss:$8 sps:$4 sm:$0xff]   ;;  %v1186_v18 = vmov 0  }
  0x1b   :  { %720 = vmatpush1.bf16.msra.mxu1 %v1045_v23  ;;  %v889_v19 = vcombine.high %v1444_v16, %v1444_v16  ;;  %v1122_v20 = vld [vmem:[%s1561_s1 + $0x130] ss:$8 sps:$4 sm:$0xff]   ;;  %v1147_v21 = vld [vmem:[%s1561_s1 + $0x324] ss:$8 sps:$4 sm:$0xff]   ;;  %v1145_v23 = vld [vmem:[%s1561_s1 + $0x320] ss:$8 sps:$4 sm:$0xff]  }
  0x1c   :  { %721 = vmatprep.subr.bf16.mxu1 %v1047_v25  ;;  %v1130_v22 = vld [vmem:[%s1561_s1 + $0x144] ss:$8 sps:$4 sm:$0xff]   ;;  %v1128_v24 = vld [vmem:[%s1561_s1 + $0x140] ss:$8 sps:$4 sm:$0xff]   ;;  %v1153_v25 = vld [vmem:[%s1561_s1 + $0x334] ss:$8 sps:$4 sm:$0xff]  }
  0x1d   :  { %802 = vmatpush1.bf16.msra.mxu0 %v1070_v30  ;;  %v1151_v27 = vld [vmem:[%s1561_s1 + $0x330] ss:$8 sps:$4 sm:$0xff]   ;;  %v1144_v30 = vld [vmem:[%s1561_s1 + $0x164] ss:$8 sps:$4 sm:$0xff]   ;;  %v1162_v40 = vld [vmem:[%s1561_s1 + $0x194] ss:$8 sps:$4 sm:$0xff]  }
  0x1e   :  { %803 = vmatprep.subr.bf16.mxu0 %v1073_v32  ;;  %v1136_v28 = vld [vmem:[%s1561_s1 + $0x150] ss:$8 sps:$4 sm:$0xff]   ;;  %v1142_v32 = vld [vmem:[%s1561_s1 + $0x160] ss:$8 sps:$4 sm:$0xff]  }
  0x1f   :  { %722 = vmatpush1.bf16.msra.mxu1 %v1051_v26  ;;  %v1138_v26 = vld [vmem:[%s1561_s1 + $0x154] ss:$8 sps:$4 sm:$0xff]   ;;  %v1103_v38 = vld [vmem:[%s1562_s0 + $0x18] ss:$0 sps:$4 sm:$0xff]  }
  0x20   :  { %723 = vmatprep.subr.bf16.mxu1 %v1053_v29  ;;  %v1159_v29 = vld [vmem:[%s1561_s1 + $0x344] ss:$8 sps:$4 sm:$0xff]   ;;  %v1181_v53 = vld [vmem:[%s1561_s1 + $0x1f0] ss:$8 sps:$4 sm:$0xff]  }
  0x21   :  { %804 = vmatpush1.bf16.msra.mxu0 %v1076_v35  ;;  %v1163_v35 = vld [vmem:[%s1561_s1 + $0x350] ss:$8 sps:$4 sm:$0xff]  }
  0x22   :  { %805 = vmatprep.subr.bf16.mxu0 %v1079_v36  ;;  %v1148_v36 = vld [vmem:[%s1561_s1 + $0x170] ss:$8 sps:$4 sm:$0xff]  }
  0x23   :  { %724 = vmatpush1.bf16.msra.mxu1 %v1057_v31  ;;  %v1157_v31 = vld [vmem:[%s1561_s1 + $0x340] ss:$8 sps:$4 sm:$0xff]  }
  0x24   :  { %725 = vmatprep.subr.bf16.mxu1 %v1059_v33  ;;  %v1165_v33 = vld [vmem:[%s1561_s1 + $0x354] ss:$8 sps:$4 sm:$0xff]  }
  0x25   :  { %806 = vmatpush1.bf16.msra.mxu0 %v1082_v39  ;;  %v1154_v39 = vld [vmem:[%s1561_s1 + $0x180] ss:$8 sps:$4 sm:$0xff]  }
  0x26   :  { %807 = vmatprep.subr.bf16.mxu0 %v1085_v42  ;;  %v1168_v42 = vld [vmem:[%s1561_s1 + $0x1a4] ss:$8 sps:$4 sm:$0xff]  }
  0x27   :  { %726 = vmatpush1.bf16.msra.mxu1 %v1063_v34  ;;  %v1150_v34 = vld [vmem:[%s1561_s1 + $0x174] ss:$8 sps:$4 sm:$0xff]  }
  0x28   :  { %727 = vmatprep.subr.bf16.mxu1 %v1065_v37  ;;  %v1156_v37 = vld [vmem:[%s1561_s1 + $0x184] ss:$8 sps:$4 sm:$0xff]  }
  0x29   :  { %808 = vmatpush1.bf16.msra.mxu0 %v1088_v44  ;;  %v1171_v44 = vld [vmem:[%s1561_s1 + $0x1b4] ss:$8 sps:$4 sm:$0xff]  }
  0x2a   :  { %809 = vmatprep.subr.bf16.mxu0 %v1091_v46  ;;  %v1174_v46 = vld [vmem:[%s1561_s1 + $0x1c4] ss:$8 sps:$4 sm:$0xff]  }
  0x2b   :  { %728 = vmatpush1.bf16.msra.mxu1 %v1069_v41  ;;  %v1160_v41 = vld [vmem:[%s1561_s1 + $0x190] ss:$8 sps:$4 sm:$0xff]  }
  0x2c   :  { %729 = vmatprep.subr.bf16.mxu1 %v1071_v43  ;;  %v1166_v43 = vld [vmem:[%s1561_s1 + $0x1a0] ss:$8 sps:$4 sm:$0xff]  }
  0x2d   :  { %810 = vmatpush1.bf16.msra.mxu0 %v1094_v48  ;;  %v1177_v48 = vld [vmem:[%s1561_s1 + $0x1d4] ss:$8 sps:$4 sm:$0xff]  }
  0x2e   :  { %811 = vmatprep.subr.bf16.mxu0 %v1097_v50  ;;  %v1180_v50 = vld [vmem:[%s1561_s1 + $0x1e4] ss:$8 sps:$4 sm:$0xff]  }
  0x2f   :  { %730 = vmatpush1.bf16.msra.mxu1 %v1075_v45  ;;  %v1169_v45 = vld [vmem:[%s1561_s1 + $0x1b0] ss:$8 sps:$4 sm:$0xff]  }
  0x30   :  { %731 = vmatprep.subr.bf16.mxu1 %v1077_v47  ;;  %v1172_v47 = vld [vmem:[%s1561_s1 + $0x1c0] ss:$8 sps:$4 sm:$0xff]  }
  0x31   :  { %812 = vmatpush1.bf16.msra.mxu0 %v1100_v52  ;;  %v1183_v52 = vld [vmem:[%s1561_s1 + $0x1f4] ss:$8 sps:$4 sm:$0xff]  }
  0x32   :  { %813 = vmatprep.subr.bf16.mxu0 %v1107_v55 }
  0x33   :  { %732 = vmatpush1.bf16.msra.mxu1 %v1081_v49  ;;  %v1175_v49 = vld [vmem:[%s1561_s1 + $0x1d0] ss:$8 sps:$4 sm:$0xff]  }
  0x34   :  { %733 = vmatprep.subr.bf16.mxu1 %v1083_v51  ;;  %v1178_v51 = vld [vmem:[%s1561_s1 + $0x1e0] ss:$8 sps:$4 sm:$0xff]  }
  0x35   :  { %814 = vmatpush1.bf16.msra.mxu0 %v1109_v58 }
  0x36   :  { %815 = vmatprep.subr.bf16.mxu0 %v1113_v60 }
  0x37   :  { %734 = vmatpush1.bf16.msra.mxu1 %v1087_v54  ;;  %v888_v54 = vcombine.low %v1444_v16, %v1444_v16 }
  0x38   :  { %735 = vmatprep.subr.bf16.mxu1 %v1089_v57 }
  0x39   :  { %816 = vmatpush1.bf16.msra.mxu0 %v1115_v62  ;;  %v127_v62 = vld [vmem:[%s1563_s2] sm:$0x3] }
  0x3a   :  { %817 = vmatprep.subr.bf16.mxu0 %v1119_v0 }
  0x3b   :  { %736 = vmatpush1.bf16.msra.mxu1 %v1093_v59  ;;  %v129_v59 = vlaneseq }
  0x3c   :  { %737 = vmatprep.subr.bf16.mxu1 %v1095_v61 }
  0x3d   :  { %818 = vmatpush1.bf16.msra.mxu0 %v1121_v3  ;;  %v130_v60 = vshrl.u32 %v129_v59, 7 }
  0x3e   :  { %819 = vmatprep.subr.bf16.mxu0 %v1125_v5 }
  0x3f   :  { %738 = vmatpush1.bf16.msra.mxu1 %v1099_v63  ;;  %v131_v61 = vsub.s32 0, %v130_v60  ;;  %v135_v63 = vsub.s32 1, %v130_v60 }
  0x40   :  { %748 = vmatprep.subr.bf16.mxu1 %v1106_v1 }
  0x41   :  { %820 = vmatpush1.bf16.msra.mxu0 %v1127_v7  ;;  %v132_v0 = vrot.slane %v127_v62, %v131_v61  ;;  %v136_v1 = vrot.slane %v127_v62, %v135_v63 }
  0x42   :  { %740 = vmatmul.mubr.bf16.vlgmr.msra.gmra.mrb[0].mxu1 %v886_v2  ;;  %830 = vmatprep.subr.bf16.mxu0 %v1135_v9 }
  0x43   :  { %749 = vmatpush1.bf16.msra.mxu1 %v1104_v4  ;;  %780 = vmatprep.mubr.bf16.mxu1 %v889_v19 }
  0x44   :  { %750 = vmatprep.subr.bf16.mxu1 %v1112_v6  ;;  %822 = vmatmul.mubr.bf16.vlgmr.msra.gmra.mrb[0].mxu0 %v890_v11 }
  0x45   :  { %831 = vmatpush1.bf16.msra.mxu0 %v1133_v12  ;;  %862 = vmatprep.mubr.bf16.mxu0 %v1186_v18 }
  0x46   :  { %832 = vmatprep.subr.bf16.mxu0 %v1141_v14 }
  0x47   :  { %751 = vmatpush1.bf16.msra.mxu1 %v1110_v8 }
  0x48   :  { %752 = vmatprep.subr.bf16.mxu1 %v1118_v10 }
  0x49   :  { %833 = vmatpush1.bf16.msra.mxu0 %v1139_v17 }
  0x4a   :  { %834 = vmatprep.subr.bf16.mxu0 %v1147_v21 }
  0x4b   :  { %753 = vmatpush1.bf16.msra.mxu1 %v1116_v13 }
  0x4c   :  { %754 = vmatprep.subr.bf16.mxu1 %v1124_v15 }
  0x4d   :  { %835 = vmatpush1.bf16.msra.mxu0 %v1145_v23 }
  0x4e   :  { %836 = vmatprep.subr.bf16.mxu0 %v1153_v25 }
  0x4f   :  { %755 = vmatpush1.bf16.msra.mxu1 %v1122_v20 }
  0x50   :  { %756 = vmatprep.subr.bf16.mxu1 %v1130_v22 }
  0x51   :  { %837 = vmatpush1.bf16.msra.mxu0 %v1151_v27 }
  0x52   :  { %838 = vmatprep.subr.bf16.mxu0 %v1159_v29 }
  0x53   :  { %757 = vmatpush1.bf16.msra.mxu1 %v1128_v24 }
  0x54   :  { %758 = vmatprep.subr.bf16.mxu1 %v1138_v26 }
  0x55   :  { %839 = vmatpush1.bf16.msra.mxu0 %v1157_v31 }
  0x56   :  { %840 = vmatprep.subr.bf16.mxu0 %v1165_v33 }
  0x57   :  { %759 = vmatpush1.bf16.msra.mxu1 %v1136_v28 }
  0x58   :  { %760 = vmatprep.subr.bf16.mxu1 %v1144_v30 }
  0x59   :  { %841 = vmatpush1.bf16.msra.mxu0 %v1163_v35 }
  0x5b   :  { %761 = vmatpush1.bf16.msra.mxu1 %v1142_v32 }
  0x5c   :  { %762 = vmatprep.subr.bf16.mxu1 %v1150_v34  ;;  %1001 = vmatmul.mubr.msk.bf16.vlgmr.msra.gmra.mrb[0].mxu0 %vm703_vm0, %v1103_v38 }
  0x5f   :  { %763 = vmatpush1.bf16.msra.mxu1 %v1148_v36 }
  0x60   :  { %764 = vmatprep.subr.bf16.mxu1 %v1156_v37 }
  0x63   :  { %765 = vmatpush1.bf16.msra.mxu1 %v1154_v39 }
  0x64   :  { %766 = vmatprep.subr.bf16.mxu1 %v1162_v40 }
  0x67   :  { %767 = vmatpush1.bf16.msra.mxu1 %v1160_v41 }
  0x68   :  { %768 = vmatprep.subr.bf16.mxu1 %v1168_v42 }
  0x6b   :  { %769 = vmatpush1.bf16.msra.mxu1 %v1166_v43 }
  0x6c   :  { %770 = vmatprep.subr.bf16.mxu1 %v1171_v44 }
  0x6f   :  { %771 = vmatpush1.bf16.msra.mxu1 %v1169_v45 }
  0x70   :  { %772 = vmatprep.subr.bf16.mxu1 %v1174_v46 }
  0x73   :  { %773 = vmatpush1.bf16.msra.mxu1 %v1172_v47 }
  0x74   :  { %774 = vmatprep.subr.bf16.mxu1 %v1177_v48 }
  0x77   :  { %775 = vmatpush1.bf16.msra.mxu1 %v1175_v49 }
  0x78   :  { %776 = vmatprep.subr.bf16.mxu1 %v1180_v50 }
  0x7b   :  { %777 = vmatpush1.bf16.msra.mxu1 %v1178_v51 }
  0x7c   :  { %778 = vmatprep.subr.bf16.mxu1 %v1183_v52 }
  0x7f   :  { %779 = vmatpush1.bf16.msra.mxu1 %v1181_v53 }
  0x82   :  { %781 = vmatmul.mubr.bf16.vlgmr.msra.gmra.mrb[0].mxu1 %v888_v54 }
 0x12f   :  { %v864_v55 = vpop.f32.mrb[0].mxu0 }
 0x130   :  { %v866_v56 = vpop.f32.mrb[1].mxu0 }
 0x131   :  { %v868_v57 = vpop.f32.mrb[2].mxu0 }
 0x132   :  { %v869_v58 = vpop.f32.mrb[3].mxu0 }
 0x155   :  { %v782_v2 = vpop.f32.mrb[0].mxu1 }
 0x156   :  { %v1004_v3 = vadd.f32 %v782_v2, %v132_v0  ;;  %v784_v4 = vpop.f32.mrb[1].mxu1 }
 0x157   :  { %v1006_v5 = vadd.f32 %v784_v4, %v136_v1  ;;  %v786_v6 = vpop.f32.mrb[2].mxu1 }
 0x158   :  { %v1005_v7 = vadd.f32 %v1004_v3, %v864_v55  ;;  %v787_v8 = vpop.f32.mrb[3].mxu1 }
 0x159   :  { %v1007_v9 = vadd.f32 %v1006_v5, %v866_v56 }
 0x15a   :  { %v871_v10 = vmax.f32 %v1005_v7, 0.0 }
 0x15b   :  { %v872_v11 = vmax.f32 %v1007_v9, 0.0 }
 0x15d   :  { %v1003_v12 = vpack.c.bf16 %v872_v11, %v871_v10 }
 0x15f   :  { %881 = vst [vmem:[%s1564_s3] sm:$0xff] %v1003_v12 }

// kernel: conv_autoencoder_forward.13
= control target key start
LH: loop header
LB: loop body
LE: loop exit
PB: predicated region body
PF: predicated region fallthrough
CT: control target
= control target key end

     0   :  { %v542_v0 = vmov 0   ;;  %vm284_vm0 = vcmask 392192   ;;  %s690_s1 = inlined_call_operand.vmem [shape: bf16[432,128], index: 1, kind: input, shape index: {}]   ;;  %s691_s0 = inlined_call_operand.vmem [shape: bf16[32,432], index: 0, kind: input, shape index: {}]   ;;  %s692_s2 = inlined_call_operand.vmem [shape: f32[1,128], index: 2, kind: input, shape index: {}]   ;;  %s693_s3 = inlined_call_operand.vmem [shape: bf16[32,128], index: 3, kind: output, shape index: {}]  }
   0x1   :  { %340 = vmatprep.subr.bf16.mxu1 %v542_v0  ;;  %v503_v1 = vld [vmem:[%s690_s1 + $0x80] sm:$0xff]   ;;  %v506_v4 = vld [vmem:[%s690_s1 + $0x88] sm:$0xff]   ;;  %v509_v7 = vld [vmem:[%s690_s1 + $0x90] sm:$0xff]  }
   0x2   :  { %v504_v2 = vld [vmem:[%s690_s1 + $0x40] sm:$0xff]   ;;  %341 = vmatpush1.bf16.msra.mxu1 %v503_v1  ;;  %v507_v5 = vld [vmem:[%s690_s1 + $0x48] sm:$0xff]   ;;  %v510_v8 = vld [vmem:[%s690_s1 + $0x50] sm:$0xff]  }
   0x3   :  { %v505_v3 = vld [vmem:[%s690_s1] sm:$0xff]   ;;  %474 = vmatprep.subr.bf16.mxu0 %v504_v2  ;;  %342 = vmatprep.subr.bf16.mxu1 %v542_v0  ;;  %v508_v6 = vld [vmem:[%s690_s1 + $0x8] sm:$0xff]   ;;  %v511_v9 = vld [vmem:[%s690_s1 + $0x10] sm:$0xff]  }
   0x4   :  { %475 = vmatpush3.bf16.msra.mxu0 %v505_v3  ;;  %v512_v10 = vld [vmem:[%s690_s1 + $0x98] sm:$0xff]   ;;  %v516_v13 = vld [vmem:[%s690_s1 + $0x60] sm:$0xff]   ;;  %v519_v16 = vld [vmem:[%s690_s1 + $0x68] sm:$0xff]  }
   0x5   :  { %476 = vmatprep.subr.bf16.mxu0 %v507_v5  ;;  %v513_v11 = vld [vmem:[%s690_s1 + $0x58] sm:$0xff]   ;;  %v515_v14 = vld [vmem:[%s690_s1 + $0xa0] sm:$0xff]   ;;  %v518_v17 = vld [vmem:[%s690_s1 + $0xa8] sm:$0xff]  }
   0x6   :  { %343 = vmatpush1.bf16.msra.mxu1 %v506_v4  ;;  %v514_v12 = vld [vmem:[%s690_s1 + $0x18] sm:$0xff]   ;;  %v517_v15 = vld [vmem:[%s690_s1 + $0x20] sm:$0xff]   ;;  %v520_v18 = vld [vmem:[%s690_s1 + $0x28] sm:$0xff]  }
   0x7   :  { %344 = vmatprep.subr.bf16.mxu1 %v542_v0  ;;  %v522_v19 = vld [vmem:[%s690_s1 + $0x70] sm:$0xff]   ;;  %v524_v22 = vld [vmem:[%s690_s1 + $0xb8] sm:$0xff]   ;;  %v527_v26 = vld [vmem:[%s690_s1 + $0xc0] sm:$0xff]  }
   0x8   :  { %477 = vmatpush3.bf16.msra.mxu0 %v508_v6  ;;  %v521_v20 = vld [vmem:[%s690_s1 + $0xb0] sm:$0xff]   ;;  %v525_v23 = vld [vmem:[%s690_s1 + $0x78] sm:$0xff]   ;;  %v531_v30 = vld [vmem:[%s690_s1 + $0xc8] sm:$0xff]  }
   0x9   :  { %478 = vmatprep.subr.bf16.mxu0 %v510_v8  ;;  %v523_v21 = vld [vmem:[%s690_s1 + $0x30] sm:$0xff]   ;;  %v526_v25 = vld [vmem:[%s690_s1 + $0x38] sm:$0xff]   ;;  %v417_v42 = vld [vmem:[%s692_s2] ss:$0 sm:$0xff] }
   0xa   :  { %345 = vmatpush1.bf16.msra.mxu1 %v509_v7  ;;  %v530_v24 = vld [vmem:[%s691_s0 + $0x4] ss:$16 sps:$4 sm:$0xff]   ;;  %v537_v27 = vld [vmem:[%s691_s0 + $0xc] ss:$16 sps:$4 sm:$0xff]   ;;  %v528_v28 = vld [vmem:[%s691_s0] ss:$16 sps:$4 sm:$0xff]  }
   0xb   :  { %346 = vmatprep.subr.bf16.mxu1 %v542_v0  ;;  %323 = vmatprep.mubr.bf16.mxu0 %v530_v24  ;;  %v533_v29 = vld [vmem:[%s691_s0 + $0x24] ss:$16 sps:$4 sm:$0xff]   ;;  %v538_v32 = vld [vmem:[%s691_s0 + $0x20] ss:$16 sps:$4 sm:$0xff]   ;;  %v535_v33 = vld [vmem:[%s691_s0 + $0x8] ss:$16 sps:$4 sm:$0xff]  }
   0xc   :  { %479 = vmatpush3.bf16.msra.mxu0 %v511_v9  ;;  %453 = vmatprep.mubr.msk.bf16.mxu1 %vm284_vm0, %v537_v27  ;;  %v532_v31 = vld [vmem:[%s690_s1 + $0xd0] sm:$0xff]   ;;  %v539_v34 = vld [vmem:[%s691_s0 + $0x2c] ss:$16 sps:$4 sm:$0xff]   ;;  %v541_v35 = vld [vmem:[%s691_s0 + $0x28] ss:$16 sps:$4 sm:$0xff]  }
   0xd   :  { %480 = vmatprep.subr.bf16.mxu0 %v513_v11 }
   0xe   :  { %347 = vmatpush1.bf16.msra.mxu1 %v512_v10 }
   0xf   :  { %348 = vmatprep.subr.bf16.mxu1 %v542_v0 }
  0x10   :  { %481 = vmatpush3.bf16.msra.mxu0 %v514_v12 }
  0x11   :  { %482 = vmatprep.subr.bf16.mxu0 %v516_v13 }
  0x12   :  { %349 = vmatpush1.bf16.msra.mxu1 %v515_v14 }
  0x13   :  { %350 = vmatprep.subr.bf16.mxu1 %v542_v0 }
  0x14   :  { %483 = vmatpush3.bf16.msra.mxu0 %v517_v15 }
  0x15   :  { %484 = vmatprep.subr.bf16.mxu0 %v519_v16 }
  0x16   :  { %351 = vmatpush1.bf16.msra.mxu1 %v518_v17 }
  0x17   :  { %352 = vmatprep.subr.bf16.mxu1 %v542_v0 }
  0x18   :  { %485 = vmatpush3.bf16.msra.mxu0 %v520_v18 }
  0x19   :  { %486 = vmatprep.subr.bf16.mxu0 %v522_v19 }
  0x1a   :  { %353 = vmatpush1.bf16.msra.mxu1 %v521_v20 }
  0x1b   :  { %354 = vmatprep.subr.bf16.mxu1 %v542_v0 }
  0x1c   :  { %487 = vmatpush3.bf16.msra.mxu0 %v523_v21 }
  0x1d   :  { %488 = vmatprep.subr.bf16.mxu0 %v525_v23 }
  0x1e   :  { %355 = vmatpush1.bf16.msra.mxu1 %v524_v22 }
  0x1f   :  { %356 = vmatprep.subr.bf16.mxu1 %v542_v0 }
  0x20   :  { %489 = vmatpush3.bf16.msra.mxu0 %v526_v25 }
  0x22   :  { %357 = vmatpush1.bf16.msra.mxu1 %v527_v26 }
  0x23   :  { %324 = vmatmul.mubr.bf16.vlgmr.msra.gmra.mrb[0].mxu0 %v528_v28  ;;  %358 = vmatprep.subr.bf16.mxu1 %v542_v0 }
  0x24   :  { %331 = vmatprep.mubr.bf16.mxu0 %v533_v29 }
  0x26   :  { %359 = vmatpush1.bf16.msra.mxu1 %v531_v30 }
  0x27   :  { %360 = vmatprep.subr.bf16.mxu1 %v542_v0 }
  0x2a   :  { %361 = vmatpush1.bf16.msra.mxu1 %v532_v31 }
  0x2b   :  { %332 = vmatmul.mubr.bf16.gmra.mrb[4].mxu0 %v538_v32 }
  0x2d   :  { %373 = vmatmul.mubr.bf16.vlgmr.msra.gmra.mrb[0].mxu1 %v535_v33 }
  0x2e   :  { %454 = vmatprep.mubr.msk.bf16.mxu1 %vm284_vm0, %v539_v34 }
  0x35   :  { %381 = vmatmul.mubr.bf16.gmra.mrb[4].mxu1 %v541_v35 }
  0xf6   :  { %v490_v36 = vpop.f32.mrb[0].mxu0 }
  0xf7   :  { %v491_v37 = vpop.f32.mrb[1].mxu0 }
  0xf8   :  { %v492_v38 = vadd.f32 %v491_v37, %v490_v36  ;;  %v493_v39 = vpop.f32.mrb[2].mxu0 }
  0xf9   :  { %v494_v40 = vpop.f32.mrb[3].mxu0 }
  0xfa   :  { %v495_v41 = vadd.f32 %v494_v40, %v493_v39  ;;  %v326_v43 = vadd.f32 %v492_v38, %v417_v42 }
  0xfc   :  { %v329_v51 = vadd.f32 %v495_v41, %v417_v42 }
  0xfe   :  { %v496_v44 = vpop.f32.mrb[4].mxu0 }
  0xff   :  { %v497_v45 = vpop.f32.mrb[5].mxu0 }
 0x100   :  { %v374_v46 = vpop.f32.mrb[0].mxu1  ;;  %v498_v47 = vadd.f32 %v497_v45, %v496_v44  ;;  %v499_v48 = vpop.f32.mrb[6].mxu0 }
 0x101   :  { %v375_v49 = vadd.f32 %v374_v46, %v326_v43  ;;  %v376_v50 = vpop.f32.mrb[1].mxu1  ;;  %v500_v52 = vpop.f32.mrb[7].mxu0 }
 0x102   :  { %v377_v53 = vpop.f32.mrb[2].mxu1  ;;  %v501_v54 = vadd.f32 %v500_v52, %v499_v48  ;;  %v334_v59 = vadd.f32 %v498_v47, %v417_v42 }
 0x103   :  { %v378_v55 = vadd.f32 %v377_v53, %v329_v51  ;;  %v379_v56 = vpop.f32.mrb[3].mxu1  ;;  %v389_v57 = vmax.f32 %v375_v49, 0.0 }
 0x104   :  { %v337_v0 = vadd.f32 %v501_v54, %v417_v42 }
 0x105   :  { %v390_v58 = vmax.f32 %v378_v55, 0.0 }
 0x107   :  { %v466_v60 = vpack.c.bf16 %v390_v58, %v389_v57 }
 0x108   :  { %v382_v61 = vpop.f32.mrb[4].mxu1 }
 0x109   :  { %467 = vst [vmem:[%s693_s3] sm:$0xff] %v466_v60   ;;  %v383_v62 = vadd.f32 %v382_v61, %v334_v59  ;;  %v384_v63 = vpop.f32.mrb[5].mxu1 }
 0x10a   :  { %v385_v1 = vpop.f32.mrb[6].mxu1 }
 0x10b   :  { %v386_v2 = vadd.f32 %v385_v1, %v337_v0  ;;  %v387_v3 = vpop.f32.mrb[7].mxu1  ;;  %v391_v4 = vmax.f32 %v383_v62, 0.0 }
 0x10d   :  { %v392_v5 = vmax.f32 %v386_v2, 0.0 }
 0x10f   :  { %v471_v6 = vpack.c.bf16 %v392_v5, %v391_v4 }
 0x111   :  { %473 = vst [vmem:[%s693_s3 + $0x8] sm:$0xff] %v471_v6  }

// kernel: conv_autoencoder_forward.14
= control target key start
LH: loop header
LB: loop body
LE: loop exit
PB: predicated region body
PF: predicated region fallthrough
CT: control target
= control target key end

     0   :  { %v629_v0 = vmov 0   ;;  %vm218_vm0 = vcmask 719872   ;;  %vm243_vm1 = vcmask 1043456   ;;  %s821_s1 = inlined_call_operand.vmem [shape: bf16[216,128], index: 1, kind: input, shape index: {}]   ;;  %s822_s0 = inlined_call_operand.vmem [shape: bf16[128,216], index: 0, kind: input, shape index: {}]   ;;  %s823_s2 = inlined_call_operand.vmem [shape: f32[1,128], index: 2, kind: input, shape index: {}]   ;;  %s824_s3 = inlined_call_operand.vmem [shape: bf16[128,128], index: 3, kind: output, shape index: {}]  }
   0x1   :  { %247 = vmatprep.subr.bf16.mxu0 %v629_v0  ;;  %562 = vmatprep.subr.bf16.mxu1 %v629_v0  ;;  %v591_v1 = vld [vmem:[%s821_s1] sm:$0xff]   ;;  %v592_v2 = vld [vmem:[%s821_s1 + $0x8] sm:$0xff]   ;;  %v593_v3 = vld [vmem:[%s821_s1 + $0x10] sm:$0xff]  }
   0x2   :  { %248 = vmatpush1.bf16.msra.mxu0 %v591_v1  ;;  %576 = vmatpush1.bf16.msra.mxu1 %v591_v1  ;;  %v594_v4 = vld [vmem:[%s821_s1 + $0x18] sm:$0xff]   ;;  %v595_v5 = vld [vmem:[%s821_s1 + $0x20] sm:$0xff]   ;;  %v596_v8 = vld [vmem:[%s821_s1 + $0x28] sm:$0xff]  }
   0x3   :  { %249 = vmatprep.subr.bf16.mxu0 %v629_v0  ;;  %563 = vmatprep.subr.bf16.mxu1 %v629_v0  ;;  %v607_v6 = vld [vmem:[%s822_s0 + $0x4] ss:$8 sps:$4 sm:$0xff]   ;;  %v597_v9 = vld [vmem:[%s821_s1 + $0x30] sm:$0xff]   ;;  %v598_v10 = vld [vmem:[%s821_s1 + $0x38] sm:$0xff]  }
   0x4   :  { %475 = vmatprep.mubr.msk.bf16.mxu0 %vm218_vm0, %v607_v6  ;;  %v610_v7 = vld [vmem:[%s822_s0 + $0x44] ss:$8 sps:$4 sm:$0xff]   ;;  %v601_v13 = vld [vmem:[%s821_s1 + $0x50] sm:$0xff]   ;;  %v602_v14 = vld [vmem:[%s821_s1 + $0x58] sm:$0xff]  }
   0x5   :  { %479 = vmatprep.mubr.msk.bf16.mxu1 %vm218_vm0, %v610_v7  ;;  %v599_v11 = vld [vmem:[%s821_s1 + $0x40] sm:$0xff]   ;;  %v600_v12 = vld [vmem:[%s821_s1 + $0x48] sm:$0xff]   ;;  %v611_v20 = vld [vmem:[%s822_s0 + $0x14] ss:$8 sps:$4 sm:$0xff]  }
   0x6   :  { %250 = vmatpush1.bf16.msra.mxu0 %v592_v2  ;;  %577 = vmatpush1.bf16.msra.mxu1 %v592_v2  ;;  %v603_v15 = vld [vmem:[%s821_s1 + $0x60] sm:$0xff]   ;;  %v604_v16 = vld [vmem:[%s821_s1 + $0x68] ss:$0 sps:$4 sm:$0xff]   ;;  %v613_v21 = vld [vmem:[%s822_s0 + $0x54] ss:$8 sps:$4 sm:$0xff]  }
   0x7   :  { %251 = vmatprep.subr.bf16.mxu0 %v629_v0  ;;  %564 = vmatprep.subr.bf16.mxu1 %v629_v0  ;;  %v245_v17 = vsel %vm243_vm1, %v604_v16, 0  ;;  %v605_v18 = vld [vmem:[%s822_s0] ss:$8 sps:$4 sm:$0xff]   ;;  %v615_v22 = vld [vmem:[%s822_s0 + $0x10] ss:$8 sps:$4 sm:$0xff]  }
   0x8   :  { %v608_v19 = vld [vmem:[%s822_s0 + $0x40] ss:$8 sps:$4 sm:$0xff]   ;;  %v616_v23 = vld [vmem:[%s822_s0 + $0x50] ss:$8 sps:$4 sm:$0xff]   ;;  %v617_v24 = vld [vmem:[%s822_s0 + $0x24] ss:$8 sps:$4 sm:$0xff]  }
   0x9   :  { %v619_v25 = vld [vmem:[%s822_s0 + $0x64] ss:$8 sps:$4 sm:$0xff]   ;;  %v621_v26 = vld [vmem:[%s822_s0 + $0x20] ss:$8 sps:$4 sm:$0xff]   ;;  %v623_v28 = vld [vmem:[%s822_s0 + $0x34] ss:$8 sps:$4 sm:$0xff]  }
   0xa   :  { %252 = vmatpush1.bf16.msra.mxu0 %v593_v3  ;;  %578 = vmatpush1.bf16.msra.mxu1 %v593_v3  ;;  %v622_v27 = vld [vmem:[%s822_s0 + $0x60] ss:$8 sps:$4 sm:$0xff]   ;;  %v625_v29 = vld [vmem:[%s822_s0 + $0x74] ss:$8 sps:$4 sm:$0xff]   ;;  %v627_v30 = vld [vmem:[%s822_s0 + $0x30] ss:$8 sps:$4 sm:$0xff]  }
   0xb   :  { %253 = vmatprep.subr.bf16.mxu0 %v629_v0  ;;  %565 = vmatprep.subr.bf16.mxu1 %v629_v0  ;;  %v628_v31 = vld [vmem:[%s822_s0 + $0x70] ss:$8 sps:$4 sm:$0xff]   ;;  %v779_v32 = vld [vmem:[%s823_s2] ss:$0 sm:$0xff] }
   0xe   :  { %254 = vmatpush1.bf16.msra.mxu0 %v594_v4  ;;  %579 = vmatpush1.bf16.msra.mxu1 %v594_v4 }
   0xf   :  { %255 = vmatprep.subr.bf16.mxu0 %v629_v0  ;;  %566 = vmatprep.subr.bf16.mxu1 %v629_v0 }
  0x12   :  { %256 = vmatpush1.bf16.msra.mxu0 %v595_v5  ;;  %580 = vmatpush1.bf16.msra.mxu1 %v595_v5 }
  0x13   :  { %257 = vmatprep.subr.bf16.mxu0 %v629_v0  ;;  %567 = vmatprep.subr.bf16.mxu1 %v629_v0 }
  0x16   :  { %258 = vmatpush1.bf16.msra.mxu0 %v596_v8  ;;  %581 = vmatpush1.bf16.msra.mxu1 %v596_v8 }
  0x17   :  { %259 = vmatprep.subr.bf16.mxu0 %v629_v0  ;;  %568 = vmatprep.subr.bf16.mxu1 %v629_v0 }
  0x1a   :  { %260 = vmatpush1.bf16.msra.mxu0 %v597_v9  ;;  %582 = vmatpush1.bf16.msra.mxu1 %v597_v9 }
  0x1b   :  { %261 = vmatprep.subr.bf16.mxu0 %v629_v0  ;;  %569 = vmatprep.subr.bf16.mxu1 %v629_v0 }
  0x1e   :  { %262 = vmatpush1.bf16.msra.mxu0 %v598_v10  ;;  %583 = vmatpush1.bf16.msra.mxu1 %v598_v10 }
  0x1f   :  { %263 = vmatprep.subr.bf16.mxu0 %v629_v0  ;;  %570 = vmatprep.subr.bf16.mxu1 %v629_v0 }
  0x22   :  { %264 = vmatpush1.bf16.msra.mxu0 %v599_v11  ;;  %584 = vmatpush1.bf16.msra.mxu1 %v599_v11 }
  0x23   :  { %265 = vmatprep.subr.bf16.mxu0 %v629_v0  ;;  %571 = vmatprep.subr.bf16.mxu1 %v629_v0 }
  0x26   :  { %266 = vmatpush1.bf16.msra.mxu0 %v600_v12  ;;  %585 = vmatpush1.bf16.msra.mxu1 %v600_v12 }
  0x27   :  { %267 = vmatprep.subr.bf16.mxu0 %v629_v0  ;;  %572 = vmatprep.subr.bf16.mxu1 %v629_v0 }
  0x2a   :  { %268 = vmatpush1.bf16.msra.mxu0 %v601_v13  ;;  %586 = vmatpush1.bf16.msra.mxu1 %v601_v13 }
  0x2b   :  { %269 = vmatprep.subr.bf16.mxu0 %v629_v0  ;;  %573 = vmatprep.subr.bf16.mxu1 %v629_v0 }
  0x2e   :  { %270 = vmatpush1.bf16.msra.mxu0 %v602_v14  ;;  %587 = vmatpush1.bf16.msra.mxu1 %v602_v14 }
  0x2f   :  { %271 = vmatprep.subr.bf16.mxu0 %v629_v0  ;;  %574 = vmatprep.subr.bf16.mxu1 %v629_v0 }
  0x32   :  { %272 = vmatpush1.bf16.msra.mxu0 %v603_v15  ;;  %588 = vmatpush1.bf16.msra.mxu1 %v603_v15 }
  0x33   :  { %273 = vmatprep.subr.bf16.mxu0 %v629_v0  ;;  %575 = vmatprep.subr.bf16.mxu1 %v629_v0 }
  0x36   :  { %274 = vmatpush1.bf16.msra.mxu0 %v245_v17  ;;  %589 = vmatpush1.bf16.msra.mxu1 %v245_v17 }
  0x39   :  { %280 = vmatmul.mubr.bf16.vlgmr.msra.gmra.mrb[0].mxu0 %v605_v18  ;;  %312 = vmatmul.mubr.bf16.vlgmr.msra.gmra.mrb[0].mxu1 %v608_v19 }
  0x3a   :  { %476 = vmatprep.mubr.msk.bf16.mxu0 %vm218_vm0, %v611_v20  ;;  %480 = vmatprep.mubr.msk.bf16.mxu1 %vm218_vm0, %v613_v21 }
  0x41   :  { %288 = vmatmul.mubr.bf16.gmra.mrb[4].mxu0 %v615_v22  ;;  %320 = vmatmul.mubr.bf16.gmra.mrb[4].mxu1 %v616_v23 }
  0x42   :  { %477 = vmatprep.mubr.msk.bf16.mxu0 %vm218_vm0, %v617_v24  ;;  %481 = vmatprep.mubr.msk.bf16.mxu1 %vm218_vm0, %v619_v25 }
  0x49   :  { %296 = vmatmul.mubr.bf16.gmra.mrb[8].mxu0 %v621_v26  ;;  %328 = vmatmul.mubr.bf16.gmra.mrb[8].mxu1 %v622_v27 }
  0x4a   :  { %478 = vmatprep.mubr.msk.bf16.mxu0 %vm218_vm0, %v623_v28  ;;  %482 = vmatprep.mubr.msk.bf16.mxu1 %vm218_vm0, %v625_v29 }
  0x51   :  { %304 = vmatmul.mubr.bf16.gmra.mrb[12].mxu0 %v627_v30  ;;  %336 = vmatmul.mubr.bf16.gmra.mrb[12].mxu1 %v628_v31 }
 0x10c   :  { %v281_v33 = vpop.f32.mrb[0].mxu0  ;;  %v313_v34 = vpop.f32.mrb[0].mxu1 }
 0x10d   :  { %v282_v35 = vadd.f32 %v779_v32, %v281_v33  ;;  %v314_v36 = vadd.f32 %v779_v32, %v313_v34  ;;  %v283_v37 = vpop.f32.mrb[1].mxu0  ;;  %v315_v38 = vpop.f32.mrb[1].mxu1 }
 0x10e   :  { %v284_v39 = vpop.f32.mrb[2].mxu0  ;;  %v316_v40 = vpop.f32.mrb[2].mxu1 }
 0x10f   :  { %v285_v41 = vadd.f32 %v779_v32, %v284_v39  ;;  %v317_v42 = vadd.f32 %v779_v32, %v316_v40  ;;  %v286_v43 = vpop.f32.mrb[3].mxu0  ;;  %v318_v44 = vpop.f32.mrb[3].mxu1  ;;  %v344_v45 = vmax.f32 %v282_v35, 0.0  ;;  %v352_v46 = vmax.f32 %v314_v36, 0.0 }
 0x111   :  { %v345_v47 = vmax.f32 %v285_v41, 0.0  ;;  %v353_v48 = vmax.f32 %v317_v42, 0.0 }
 0x113   :  { %v518_v49 = vpack.c.bf16 %v345_v47, %v344_v45  ;;  %v538_v50 = vpack.c.bf16 %v353_v48, %v352_v46 }
 0x114   :  { %v289_v51 = vpop.f32.mrb[4].mxu0  ;;  %v321_v52 = vpop.f32.mrb[4].mxu1 }
 0x115   :  { %519 = vst [vmem:[%s824_s3] sm:$0xff] %v518_v49   ;;  %558 = vst [vmem:[%s824_s3 + $0x20] sm:$0xff] %v538_v50   ;;  %v290_v53 = vadd.f32 %v779_v32, %v289_v51  ;;  %v322_v54 = vadd.f32 %v779_v32, %v321_v52  ;;  %v291_v55 = vpop.f32.mrb[5].mxu0  ;;  %v323_v56 = vpop.f32.mrb[5].mxu1 }
 0x116   :  { %v292_v57 = vpop.f32.mrb[6].mxu0  ;;  %v324_v58 = vpop.f32.mrb[6].mxu1 }
 0x117   :  { %v293_v59 = vadd.f32 %v779_v32, %v292_v57  ;;  %v325_v60 = vadd.f32 %v779_v32, %v324_v58  ;;  %v294_v61 = vpop.f32.mrb[7].mxu0  ;;  %v326_v62 = vpop.f32.mrb[7].mxu1  ;;  %v346_v63 = vmax.f32 %v290_v53, 0.0  ;;  %v354_v0 = vmax.f32 %v322_v54, 0.0 }
 0x119   :  { %v347_v1 = vmax.f32 %v293_v59, 0.0  ;;  %v355_v2 = vmax.f32 %v325_v60, 0.0 }
 0x11b   :  { %v523_v3 = vpack.c.bf16 %v347_v1, %v346_v63  ;;  %v543_v4 = vpack.c.bf16 %v355_v2, %v354_v0 }
 0x11c   :  { %v297_v5 = vpop.f32.mrb[8].mxu0  ;;  %v329_v6 = vpop.f32.mrb[8].mxu1 }
 0x11d   :  { %555 = vst [vmem:[%s824_s3 + $0x8] sm:$0xff] %v523_v3   ;;  %559 = vst [vmem:[%s824_s3 + $0x28] sm:$0xff] %v543_v4   ;;  %v298_v7 = vadd.f32 %v779_v32, %v297_v5  ;;  %v330_v8 = vadd.f32 %v779_v32, %v329_v6  ;;  %v299_v9 = vpop.f32.mrb[9].mxu0  ;;  %v331_v10 = vpop.f32.mrb[9].mxu1 }
 0x11e   :  { %v300_v11 = vpop.f32.mrb[10].mxu0  ;;  %v332_v12 = vpop.f32.mrb[10].mxu1 }
 0x11f   :  { %v301_v13 = vadd.f32 %v779_v32, %v300_v11  ;;  %v333_v14 = vadd.f32 %v779_v32, %v332_v12  ;;  %v302_v15 = vpop.f32.mrb[11].mxu0  ;;  %v334_v16 = vpop.f32.mrb[11].mxu1  ;;  %v348_v17 = vmax.f32 %v298_v7, 0.0  ;;  %v356_v18 = vmax.f32 %v330_v8, 0.0 }
 0x121   :  { %v349_v19 = vmax.f32 %v301_v13, 0.0  ;;  %v357_v20 = vmax.f32 %v333_v14, 0.0 }
 0x123   :  { %v528_v21 = vpack.c.bf16 %v349_v19, %v348_v17  ;;  %v548_v22 = vpack.c.bf16 %v357_v20, %v356_v18 }
 0x124   :  { %v305_v23 = vpop.f32.mrb[12].mxu0  ;;  %v337_v24 = vpop.f32.mrb[12].mxu1 }
 0x125   :  { %556 = vst [vmem:[%s824_s3 + $0x10] sm:$0xff] %v528_v21   ;;  %560 = vst [vmem:[%s824_s3 + $0x30] sm:$0xff] %v548_v22   ;;  %v306_v25 = vadd.f32 %v779_v32, %v305_v23  ;;  %v338_v26 = vadd.f32 %v779_v32, %v337_v24  ;;  %v307_v27 = vpop.f32.mrb[13].mxu0  ;;  %v339_v28 = vpop.f32.mrb[13].mxu1 }
 0x126   :  { %v308_v29 = vpop.f32.mrb[14].mxu0  ;;  %v340_v30 = vpop.f32.mrb[14].mxu1 }
 0x127   :  { %v309_v31 = vadd.f32 %v779_v32, %v308_v29  ;;  %v341_v33 = vadd.f32 %v779_v32, %v340_v30  ;;  %v310_v34 = vpop.f32.mrb[15].mxu0  ;;  %v342_v35 = vpop.f32.mrb[15].mxu1  ;;  %v350_v36 = vmax.f32 %v306_v25, 0.0  ;;  %v358_v37 = vmax.f32 %v338_v26, 0.0 }
 0x129   :  { %v351_v38 = vmax.f32 %v309_v31, 0.0  ;;  %v359_v39 = vmax.f32 %v341_v33, 0.0 }
 0x12b   :  { %v533_v40 = vpack.c.bf16 %v351_v38, %v350_v36  ;;  %v553_v41 = vpack.c.bf16 %v359_v39, %v358_v37 }
 0x12d   :  { %557 = vst [vmem:[%s824_s3 + $0x18] sm:$0xff] %v533_v40   ;;  %561 = vst [vmem:[%s824_s3 + $0x38] sm:$0xff] %v553_v41  }

// kernel: conv_autoencoder_forward.15
= control target key start
LH: loop header
LB: loop body
LE: loop exit
PB: predicated region body
PF: predicated region fallthrough
CT: control target
= control target key end

     0   :  { %s942_s12 = smov 0   ;;  %s1089_s0 = inlined_call_operand.vmem [shape: bf16[512,108], index: 0, kind: input, shape index: {}]   ;;  %s1090_s1 = inlined_call_operand.vmem [shape: bf16[108,128], index: 1, kind: input, shape index: {}]   ;;  %s1091_s2 = inlined_call_operand.vmem [shape: f32[1,128], index: 2, kind: input, shape index: {}]   ;;  %s1092_s3 = inlined_call_operand.vmem [shape: f32[512,128], index: 3, kind: output, shape index: {}]  }
   0x1 LB: > { %s683_s13 = sadd.s32 4294967295, %s920_s12   ;;  %p687_p0 = scmp.ge.s32.totalorder %s920_s12, 1  ;;  %s920_s12 = sphi %s942_s12, %s13_s12  }
   0x2   : > { %p138_p1 = scmp.lt.s32.totalorder %s920_s12, 3 }
   0x4   : > { %p139_p2 = pnand %p687_p0, %p138_p1 }
   0x5   : > { %v827_v0 = vld [vmem:[%s1090_s1] sm:$0xff] (!%p139_p2)   ;;  %v828_v1 = vld [vmem:[%s1090_s1 + $0x8] sm:$0xff] (!%p139_p2)   ;;  %s688_s18 = sshll.u32 (!%p139_p2), %s683_s13, 5  ;;  %v829_v2 = vld [vmem:[%s1090_s1 + $0x10] sm:$0xff] (!%p139_p2)   ;;  %vm349_vm0 = vcmask (!%p139_p2), 883712   ;;  %vm398_vm1 = vcmask (!%p139_p2), 1045504  }
   0x6   : > { %142 = sbr.rel (%p139_p2) target bundleno = 294 (0x126), region = 32  ;;  %757 = vmatprep.subr.bf16.mxu0 (!%p139_p2), %v827_v0  ;;  %803 = vmatprep.subr.bf16.mxu1 (!%p139_p2), %v827_v0  ;;  %p163_p3 = scmp.lt.s32.totalorder (!%p139_p2), %s688_s18, 63  ;;  %v830_v3 = vld [vmem:[%s1090_s1 + $0x18] sm:$0xff] (!%p139_p2)   ;;  %v831_v6 = vld [vmem:[%s1090_s1 + $0x20] sm:$0xff] (!%p139_p2)   ;;  %v832_v7 = vld [vmem:[%s1090_s1 + $0x28] sm:$0xff] (!%p139_p2)  }
   0x7   : > { %758 = vmatpush3.bf16.msra.mxu0 (!%p139_p2), %v827_v0  ;;  %810 = vmatpush3.bf16.msra.mxu1 (!%p139_p2), %v827_v0  ;;  %v833_v8 = vld [vmem:[%s1090_s1 + $0x30] sm:$0x3f] (!%p139_p2)   ;;  %v1014_v24 = vld [vmem:[%s1091_s2] ss:$0 sm:$0xff] (!%p139_p2) }
   0x8   : > { %759 = vmatprep.subr.bf16.mxu0 (!%p139_p2), %v828_v1  ;;  %804 = vmatprep.subr.bf16.mxu1 (!%p139_p2), %v828_v1  ;;  %v400_v9 = vsel (!%p139_p2), %vm398_vm1, %v833_v8, 0 }
   0xb   : > { %760 = vmatpush3.bf16.msra.mxu0 (!%p139_p2), %v828_v1  ;;  %811 = vmatpush3.bf16.msra.mxu1 (!%p139_p2), %v828_v1 }
   0xc   : > { %761 = vmatprep.subr.bf16.mxu0 (!%p139_p2), %v829_v2  ;;  %805 = vmatprep.subr.bf16.mxu1 (!%p139_p2), %v829_v2 }
   0xd   : > { %s1094_s18 = smov (!%p163_p3, %s688_s18), 63 }
   0xe   : > { %s689_s21 = sshll.u32 %s1094_s18, 2  ;;  %s691_s8 = sshll.u32 %s1094_s18, 3 }
   0xf   : > { %s968_s26 = scalar_lea.vmem %s1089_s0, %s689_s21  ;;  %762 = vmatpush3.bf16.msra.mxu0 %v829_v2  ;;  %812 = vmatpush3.bf16.msra.mxu1 %v829_v2  ;;  %s1032_s11 = scalar_lea.vmem %s1092_s3, %s691_s8 }
  0x10   : > { %v834_v4 = vld [vmem:[%s968_s26] sm:$0xff]   ;;  %763 = vmatprep.subr.bf16.mxu0 %v830_v3  ;;  %806 = vmatprep.subr.bf16.mxu1 %v830_v3  ;;  %v836_v10 = vld [vmem:[%s968_s26 + $0x8] sm:$0xff]   ;;  %v838_v12 = vld [vmem:[%s968_s26 + $0x10] sm:$0xff]  }
  0x11   : > { %v835_v5 = vld [vmem:[%s968_s26 + $0x40] sm:$0xff]   ;;  %771 = vmatprep.mubr.msk.bf16.mxu0 %vm349_vm0, %v834_v4  ;;  %v837_v11 = vld [vmem:[%s968_s26 + $0x48] sm:$0xff]   ;;  %v839_v13 = vld [vmem:[%s968_s26 + $0x50] sm:$0xff]  }
  0x12   : > { %787 = vmatprep.mubr.msk.bf16.mxu1 %vm349_vm0, %v835_v5  ;;  %v840_v14 = vld [vmem:[%s968_s26 + $0x18] sm:$0xff]   ;;  %v842_v16 = vld [vmem:[%s968_s26 + $0x20] sm:$0xff]   ;;  %v844_v18 = vld [vmem:[%s968_s26 + $0x28] sm:$0xff]  }
  0x13   : > { %764 = vmatpush3.bf16.msra.mxu0 %v830_v3  ;;  %813 = vmatpush3.bf16.msra.mxu1 %v830_v3  ;;  %v841_v15 = vld [vmem:[%s968_s26 + $0x58] sm:$0xff]   ;;  %v843_v17 = vld [vmem:[%s968_s26 + $0x60] sm:$0xff]   ;;  %v845_v19 = vld [vmem:[%s968_s26 + $0x68] sm:$0xff]  }
  0x14   : > { %765 = vmatprep.subr.bf16.mxu0 %v831_v6  ;;  %807 = vmatprep.subr.bf16.mxu1 %v831_v6  ;;  %v846_v20 = vld [vmem:[%s968_s26 + $0x30] sm:$0xff]   ;;  %v848_v22 = vld [vmem:[%s968_s26 + $0x38] sm:$0xff]  }
  0x15   : > { %v847_v21 = vld [vmem:[%s968_s26 + $0x70] sm:$0xff]   ;;  %v849_v23 = vld [vmem:[%s968_s26 + $0x78] sm:$0xff]  }
  0x17   : > { %766 = vmatpush3.bf16.msra.mxu0 %v831_v6  ;;  %814 = vmatpush3.bf16.msra.mxu1 %v831_v6 }
  0x18   : > { %767 = vmatprep.subr.bf16.mxu0 %v832_v7  ;;  %808 = vmatprep.subr.bf16.mxu1 %v832_v7 }
  0x1b   : > { %768 = vmatpush3.bf16.msra.mxu0 %v832_v7  ;;  %815 = vmatpush3.bf16.msra.mxu1 %v832_v7 }
  0x1c   : > { %817 = vmatprep.subr.msk.bf16.mxu0 %vm398_vm1, %v833_v8  ;;  %818 = vmatprep.subr.msk.bf16.mxu1 %vm398_vm1, %v833_v8 }
  0x1f   : > { %770 = vmatpush3.bf16.msra.mxu0 %v400_v9  ;;  %816 = vmatpush3.bf16.msra.mxu1 %v400_v9 }
  0x22   : > { %772 = vmatmul.mubr.msk.bf16.vlgmr.msra.gmra.mrb[0].mxu0 %vm349_vm0, %v836_v10  ;;  %788 = vmatmul.mubr.msk.bf16.vlgmr.msra.gmra.mrb[0].mxu1 %vm349_vm0, %v837_v11 }
  0x23   : > { %775 = vmatprep.mubr.msk.bf16.mxu0 %vm349_vm0, %v838_v12  ;;  %791 = vmatprep.mubr.msk.bf16.mxu1 %vm349_vm0, %v839_v13 }
  0x2a   : > { %776 = vmatmul.mubr.msk.bf16.gmra.mrb[4].mxu0 %vm349_vm0, %v840_v14  ;;  %792 = vmatmul.mubr.msk.bf16.gmra.mrb[4].mxu1 %vm349_vm0, %v841_v15 }
  0x2b   : > { %779 = vmatprep.mubr.msk.bf16.mxu0 %vm349_vm0, %v842_v16  ;;  %795 = vmatprep.mubr.msk.bf16.mxu1 %vm349_vm0, %v843_v17 }
  0x32   : > { %780 = vmatmul.mubr.msk.bf16.gmra.mrb[8].mxu0 %vm349_vm0, %v844_v18  ;;  %796 = vmatmul.mubr.msk.bf16.gmra.mrb[8].mxu1 %vm349_vm0, %v845_v19 }
  0x33   : > { %783 = vmatprep.mubr.msk.bf16.mxu0 %vm349_vm0, %v846_v20  ;;  %799 = vmatprep.mubr.msk.bf16.mxu1 %vm349_vm0, %v847_v21 }
  0x3a   : > { %784 = vmatmul.mubr.msk.bf16.gmra.mrb[12].mxu0 %vm349_vm0, %v848_v22  ;;  %800 = vmatmul.mubr.msk.bf16.gmra.mrb[12].mxu1 %vm349_vm0, %v849_v23 }
  0xf5   : > { %v773_v25 = vpop.f32.mrb[0].mxu0  ;;  %v789_v26 = vpop.f32.mrb[0].mxu1 }
  0xf6   : > { %v445_v27 = vadd.f32 %v773_v25, %v1014_v24  ;;  %v509_v28 = vadd.f32 %v789_v26, %v1014_v24  ;;  %v436_v29 = vpop.f32.mrb[1].mxu0  ;;  %v500_v30 = vpop.f32.mrb[1].mxu1 }
  0xf7   : > { %v437_v31 = vadd.f32 %v1014_v24, %v436_v29  ;;  %v501_v32 = vadd.f32 %v1014_v24, %v500_v30  ;;  %v774_v33 = vpop.f32.mrb[2].mxu0  ;;  %v790_v34 = vpop.f32.mrb[2].mxu1 }
  0xf8   : > { %850 = vtanh.f32 %v445_v27  ;;  %v448_v35 = vadd.f32 %v774_v33, %v1014_v24  ;;  %v439_v36 = vpop.f32.mrb[3].mxu0  ;;  %v503_v37 = vpop.f32.mrb[3].mxu1  ;;  %v512_v38 = vadd.f32 %v790_v34, %v1014_v24 }
  0xf9   : > { %852 = vtanh.f32 %v509_v28  ;;  %v440_v39 = vadd.f32 %v1014_v24, %v439_v36  ;;  %v504_v40 = vadd.f32 %v1014_v24, %v503_v37 }
  0xfa   : > { %854 = vtanh.f32 %v437_v31 }
  0xfb   : > { %856 = vtanh.f32 %v501_v32 }
  0xfc   : > { %858 = vtanh.f32 %v448_v35 }
  0xfd   : > { %860 = vtanh.f32 %v512_v38  ;;  %v777_v41 = vpop.f32.mrb[4].mxu0  ;;  %v793_v42 = vpop.f32.mrb[4].mxu1 }
  0xfe   : > { %862 = vtanh.f32 %v440_v39  ;;  %v461_v43 = vadd.f32 %v777_v41, %v1014_v24  ;;  %v525_v44 = vadd.f32 %v793_v42, %v1014_v24  ;;  %v452_v45 = vpop.f32.mrb[5].mxu0  ;;  %v516_v46 = vpop.f32.mrb[5].mxu1 }
  0xff   : > { %864 = vtanh.f32 %v504_v40  ;;  %v453_v47 = vadd.f32 %v1014_v24, %v452_v45  ;;  %v517_v48 = vadd.f32 %v1014_v24, %v516_v46  ;;  %v778_v49 = vpop.f32.mrb[6].mxu0  ;;  %v794_v50 = vpop.f32.mrb[6].mxu1 }
 0x100   : > { %866 = vtanh.f32 %v461_v43  ;;  %v464_v51 = vadd.f32 %v778_v49, %v1014_v24  ;;  %v455_v52 = vpop.f32.mrb[7].mxu0  ;;  %v519_v53 = vpop.f32.mrb[7].mxu1  ;;  %v528_v54 = vadd.f32 %v794_v50, %v1014_v24 }
 0x101   : > { %868 = vtanh.f32 %v525_v44  ;;  %v456_v56 = vadd.f32 %v1014_v24, %v455_v52  ;;  %v520_v58 = vadd.f32 %v1014_v24, %v519_v53 }
 0x102   : > { %v851_v55 = vpop.eup %850  ;;  %870 = vtanh.f32 %v453_v47 }
 0x103   : > { %v853_v57 = vpop.eup %852  ;;  %597 = vst [vmem:[%s1032_s11 + $0x10] sm:$0xff] %v851_v55  ;;  %872 = vtanh.f32 %v517_v48 }
 0x104   : > { %v855_v59 = vpop.eup %854  ;;  %613 = vst [vmem:[%s1032_s11 + $0x90] sm:$0xff] %v853_v57  ;;  %874 = vtanh.f32 %v464_v51 }
 0x105   : > { %v857_v60 = vpop.eup %856  ;;  %595 = vst [vmem:[%s1032_s11] sm:$0xff] %v855_v59  ;;  %876 = vtanh.f32 %v528_v54  ;;  %v781_v61 = vpop.f32.mrb[8].mxu0 }
 0x106   : > { %v797_v62 = vpop.f32.mrb[8].mxu1  ;;  %v859_v63 = vpop.eup %858  ;;  %611 = vst [vmem:[%s1032_s11 + $0x80] sm:$0xff] %v857_v60  ;;  %878 = vtanh.f32 %v456_v56  ;;  %v477_v0 = vadd.f32 %v781_v61, %v1014_v24 }
 0x107   : > { %v541_v1 = vadd.f32 %v797_v62, %v1014_v24  ;;  %v468_v2 = vpop.f32.mrb[9].mxu0  ;;  %v532_v3 = vpop.f32.mrb[9].mxu1  ;;  %598 = vst [vmem:[%s1032_s11 + $0x18] sm:$0xff] %v859_v63  ;;  %880 = vtanh.f32 %v520_v58 }
 0x108   : > { %v861_v4 = vpop.eup %860  ;;  %v469_v5 = vadd.f32 %v1014_v24, %v468_v2  ;;  %v533_v6 = vadd.f32 %v1014_v24, %v532_v3  ;;  %v782_v7 = vpop.f32.mrb[10].mxu0  ;;  %882 = vtanh.f32 %v477_v0 }
 0x109   : > { %v798_v8 = vpop.f32.mrb[10].mxu1  ;;  %v863_v9 = vpop.eup %862  ;;  %614 = vst [vmem:[%s1032_s11 + $0x98] sm:$0xff] %v861_v4  ;;  %v480_v10 = vadd.f32 %v782_v7, %v1014_v24  ;;  %884 = vtanh.f32 %v541_v1 }
 0x10a   : > { %v471_v11 = vpop.f32.mrb[11].mxu0  ;;  %v535_v12 = vpop.f32.mrb[11].mxu1  ;;  %596 = vst [vmem:[%s1032_s11 + $0x8] sm:$0xff] %v863_v9  ;;  %v544_v14 = vadd.f32 %v798_v8, %v1014_v24  ;;  %886 = vtanh.f32 %v469_v5 }
 0x10b   : > { %v865_v13 = vpop.eup %864  ;;  %v472_v16 = vadd.f32 %v1014_v24, %v471_v11  ;;  %888 = vtanh.f32 %v533_v6  ;;  %v536_v18 = vadd.f32 %v1014_v24, %v535_v12 }
 0x10c   : > { %v867_v15 = vpop.eup %866  ;;  %612 = vst [vmem:[%s1032_s11 + $0x88] sm:$0xff] %v865_v13  ;;  %890 = vtanh.f32 %v480_v10 }
 0x10d   : > { %v869_v17 = vpop.eup %868  ;;  %601 = vst [vmem:[%s1032_s11 + $0x30] sm:$0xff] %v867_v15  ;;  %892 = vtanh.f32 %v544_v14  ;;  %v785_v21 = vpop.f32.mrb[12].mxu0 }
 0x10e   : > { %v871_v19 = vpop.eup %870  ;;  %617 = vst [vmem:[%s1032_s11 + $0xb0] sm:$0xff] %v869_v17  ;;  %v801_v22 = vpop.f32.mrb[12].mxu1  ;;  %894 = vtanh.f32 %v472_v16  ;;  %v493_v25 = vadd.f32 %v785_v21, %v1014_v24 }
 0x10f   : > { %v873_v20 = vpop.eup %872  ;;  %599 = vst [vmem:[%s1032_s11 + $0x20] sm:$0xff] %v871_v19  ;;  %v557_v26 = vadd.f32 %v801_v22, %v1014_v24  ;;  %v484_v27 = vpop.f32.mrb[13].mxu0  ;;  %896 = vtanh.f32 %v536_v18 }
 0x110   : > { %v875_v23 = vpop.eup %874  ;;  %615 = vst [vmem:[%s1032_s11 + $0xa0] sm:$0xff] %v873_v20  ;;  %v548_v28 = vpop.f32.mrb[13].mxu1  ;;  %v485_v30 = vadd.f32 %v1014_v24, %v484_v27  ;;  %898 = vtanh.f32 %v493_v25 }
 0x111   : > { %v877_v29 = vpop.eup %876  ;;  %602 = vst [vmem:[%s1032_s11 + $0x38] sm:$0xff] %v875_v23  ;;  %v549_v31 = vadd.f32 %v1014_v24, %v548_v28  ;;  %v786_v32 = vpop.f32.mrb[14].mxu0  ;;  %900 = vtanh.f32 %v557_v26 }
 0x112   : > { %v802_v33 = vpop.f32.mrb[14].mxu1  ;;  %v879_v34 = vpop.eup %878  ;;  %618 = vst [vmem:[%s1032_s11 + $0xb8] sm:$0xff] %v877_v29  ;;  %v496_v35 = vadd.f32 %v786_v32, %v1014_v24  ;;  %902 = vtanh.f32 %v485_v30 }
 0x113   : > { %v487_v36 = vpop.f32.mrb[15].mxu0  ;;  %v551_v37 = vpop.f32.mrb[15].mxu1  ;;  %600 = vst [vmem:[%s1032_s11 + $0x28] sm:$0xff] %v879_v34  ;;  %v560_v39 = vadd.f32 %v802_v33, %v1014_v24  ;;  %904 = vtanh.f32 %v549_v31 }
 0x114   : > { %v881_v38 = vpop.eup %880  ;;  %v488_v41 = vadd.f32 %v1014_v24, %v487_v36  ;;  %v552_v43 = vadd.f32 %v1014_v24, %v551_v37  ;;  %906 = vtanh.f32 %v496_v35 }
 0x115   : > { %v883_v40 = vpop.eup %882  ;;  %616 = vst [vmem:[%s1032_s11 + $0xa8] sm:$0xff] %v881_v38  ;;  %908 = vtanh.f32 %v560_v39 }
 0x116   : > { %v885_v42 = vpop.eup %884  ;;  %605 = vst [vmem:[%s1032_s11 + $0x50] sm:$0xff] %v883_v40  ;;  %910 = vtanh.f32 %v488_v41 }
 0x117   : > { %v887_v44 = vpop.eup %886  ;;  %621 = vst [vmem:[%s1032_s11 + $0xd0] sm:$0xff] %v885_v42  ;;  %912 = vtanh.f32 %v552_v43 }
 0x118   : > { %v889_v45 = vpop.eup %888  ;;  %603 = vst [vmem:[%s1032_s11 + $0x40] sm:$0xff] %v887_v44 }
 0x119   : > { %v891_v46 = vpop.eup %890  ;;  %619 = vst [vmem:[%s1032_s11 + $0xc0] sm:$0xff] %v889_v45 }
 0x11a   : > { %v893_v47 = vpop.eup %892  ;;  %606 = vst [vmem:[%s1032_s11 + $0x58] sm:$0xff] %v891_v46 }
 0x11b   : > { %v895_v24 = vpop.eup %894  ;;  %622 = vst [vmem:[%s1032_s11 + $0xd8] sm:$0xff] %v893_v47 }
 0x11c   : > { %v897_v48 = vpop.eup %896  ;;  %604 = vst [vmem:[%s1032_s11 + $0x48] sm:$0xff] %v895_v24 }
 0x11d   : > { %v899_v49 = vpop.eup %898  ;;  %620 = vst [vmem:[%s1032_s11 + $0xc8] sm:$0xff] %v897_v48 }
 0x11e   : > { %v901_v50 = vpop.eup %900  ;;  %609 = vst [vmem:[%s1032_s11 + $0x70] sm:$0xff] %v899_v49 }
 0x11f   : > { %v903_v51 = vpop.eup %902  ;;  %625 = vst [vmem:[%s1032_s11 + $0xf0] sm:$0xff] %v901_v50 }
 0x120   : > { %v905_v52 = vpop.eup %904  ;;  %607 = vst [vmem:[%s1032_s11 + $0x60] sm:$0xff] %v903_v51 }
 0x121   : > { %v907_v53 = vpop.eup %906  ;;  %623 = vst [vmem:[%s1032_s11 + $0xe0] sm:$0xff] %v905_v52 }
 0x122   : > { %v909_v54 = vpop.eup %908  ;;  %610 = vst [vmem:[%s1032_s11 + $0x78] sm:$0xff] %v907_v53 }
 0x123   : > { %v911_v55 = vpop.eup %910  ;;  %626 = vst [vmem:[%s1032_s11 + $0xf8] sm:$0xff] %v909_v54 }
 0x124   : > { %v913_v56 = vpop.eup %912  ;;  %608 = vst [vmem:[%s1032_s11 + $0x68] sm:$0xff] %v911_v55 }
 0x125   : > { %624 = vst [vmem:[%s1032_s11 + $0xe8] sm:$0xff] %v913_v56 }
 0x126 PF: > { %s13_s12 = sadd.s32 1, %s920_s12  }
 0x127   : > { %p10_p4 = scmp.ge.s32.totalorder %s13_s12, 4  }
 0x129   :  { %12 = sbr.rel (!%p10_p4) target bundleno = 1 (0x1), region = 62 }

</bundles_post_ra>
